<compile_context>
chip_gen: v6e
topology: v6e:2x2x1
jax: 0.10.0
libtpu: 0.0.40
codegen_flags: <defaults>
</compile_context>

<pallas_src>
import functools

import jax
import jax.numpy as jnp
from jax import lax
from jax.experimental import pallas as pl
from jax.experimental.pallas import tpu as pltpu

LANE = 128
SUB = 8


def _round_up(x, m):
    return (x + m - 1) // m * m


def _l2_normalize(x):
    """Row L2 norm; zero rows (only the padded ones in practice) stay zero."""
    ss = jnp.sum(x * x, axis=1, keepdims=True)
    inv = jnp.where(ss > 0.0, lax.rsqrt(ss), 0.0)
    return x * inv


# --------------------------------------------------------------------- fused kernel
def _in_layer_kernel(n_edge_w, n_node_w, alpha_node, alpha_edge,
                     apply_beta, beta_node, beta_edge, *refs):
    (x_ref, e_ref, srcc_ref, dstc_ref, dstr_ref, deg_ref) = refs[:6]
    ew = refs[6:6 + n_edge_w]                       # W0a, W0b, W0c, W1, ..., Wlast
    nw = refs[6 + n_edge_w:6 + n_edge_w + n_node_w]  # V0a, V0b, V1, ..., Vlast
    e_out_ref = refs[6 + n_edge_w + n_node_w]
    x_out_ref = refs[7 + n_edge_w + n_node_w]
    agg_ref = refs[8 + n_edge_w + n_node_w]          # VMEM accumulator [N, Fe_out]

    t = pl.program_id(0)
    n_tiles = pl.num_programs(0)

    @pl.when(t == 0)
    def _init():
        agg_ref[...] = jnp.zeros_like(agg_ref)

    n_pad = x_ref.shape[0]
    te = e_ref.shape[0]

    x_f32 = x_ref[...]                               # [N, Fn]   (resident block)
    x_bf = x_f32.astype(jnp.bfloat16)
    e_f32 = e_ref[...]                               # [TE, Fe]  (edge tile)

    # In-register one-hot gather / scatter operands built from the edge indices.
    src_c = srcc_ref[...]                            # [TE, 1] int32
    dst_c = dstc_ref[...]                            # [TE, 1] int32
    dst_r = dstr_ref[...]                            # [1, TE] int32
    edge_iota = lax.broadcasted_iota(jnp.int32, (te, n_pad), 1)
    oh_src = (edge_iota == src_c).astype(jnp.bfloat16)      # [TE, N]
    oh_dst = (edge_iota == dst_c).astype(jnp.bfloat16)      # [TE, N]
    node_iota = lax.broadcasted_iota(jnp.int32, (n_pad, te), 0)
    oh_dst_t = (node_iota == dst_r).astype(jnp.bfloat16)    # [N, TE]

    # Gather endpoint node features on the MXU.
    x_src = jnp.dot(oh_src, x_bf, preferred_element_type=jnp.float32)  # [TE, Fn]
    x_dst = jnp.dot(oh_dst, x_bf, preferred_element_type=jnp.float32)

    # Edge MLP; split first weight == concat([x_src, x_dst, e]) @ W0, no concat.
    h = jnp.dot(x_src.astype(jnp.bfloat16), ew[0][...],
                preferred_element_type=jnp.float32)
    h = h + jnp.dot(x_dst.astype(jnp.bfloat16), ew[1][...],
                    preferred_element_type=jnp.float32)
    h = h + jnp.dot(e_f32.astype(jnp.bfloat16), ew[2][...],
                    preferred_element_type=jnp.float32)
    for i in range(3, n_edge_w):
        h = jnp.maximum(h, 0.0)
        h = jnp.dot(h.astype(jnp.bfloat16), ew[i][...],
                    preferred_element_type=jnp.float32)
    e_new = h
    if alpha_edge != 0.0:
        e_new = e_new + alpha_edge * e_f32

    # Scatter-add messages into the per-node accumulator (reduction over tiles).
    agg_ref[...] += jnp.dot(oh_dst_t, e_new.astype(jnp.bfloat16),
                            preferred_element_type=jnp.float32)

    # Edge epilogue while the tile is still in vregs: L2 norm + beta residual.
    e_n = _l2_normalize(e_new)
    if apply_beta:
        e_out_ref[...] = e_f32 + beta_edge * e_n
    else:
        e_out_ref[...] = e_n

    # Node update only once the aggregation over all edge tiles is complete.
    @pl.when(t == n_tiles - 1)
    def _node_update():
        agg = agg_ref[...] / deg_ref[...]
        g = jnp.dot(x_bf, nw[0][...], preferred_element_type=jnp.float32)
        g = g + jnp.dot(agg.astype(jnp.bfloat16), nw[1][...],
                        preferred_element_type=jnp.float32)
        for i in range(2, n_node_w):
            g = jnp.maximum(g, 0.0)
            g = jnp.dot(g.astype(jnp.bfloat16), nw[i][...],
                        preferred_element_type=jnp.float32)
        x_new = g
        if alpha_node != 0.0:
            x_new = x_new + alpha_node * x_f32
        x_n = _l2_normalize(x_new)
        if apply_beta:
            x_out_ref[...] = x_f32 + beta_node * x_n
        else:
            x_out_ref[...] = x_n


# --------------------------------------------------------------------- layer wrapper
def in_layer_forward(x_p, e_p, src_col, dst_col, dst_row, deg_p,
                     edge_ws, node_ws, *, tile_edges,
                     alpha_node, alpha_edge, apply_beta, beta_node, beta_edge):
    n_pad, fn_in = x_p.shape
    e_pad, fe_in = e_p.shape
    fe_out = edge_ws[-1].shape[1]
    fn_out = node_ws[-1].shape[1]
    te = tile_edges
    assert e_pad % te == 0
    n_tiles = e_pad // te
    n_ew, n_nw = len(edge_ws), len(node_ws)

    def _full(shape):
        nd = len(shape)
        return pl.BlockSpec(shape, lambda t, _nd=nd: (0,) * _nd)

    in_specs = ([
        _full((n_pad, fn_in)),                              # x (resident)
        pl.BlockSpec((te, fe_in), lambda t: (t, 0)),        # edge_attr tile
        pl.BlockSpec((te, 1), lambda t: (t, 0)),            # src (column)
        pl.BlockSpec((te, 1), lambda t: (t, 0)),            # dst (column)
        pl.BlockSpec((1, te), lambda t: (0, t)),            # dst (row)
        _full((n_pad, 1)),                                  # deg (resident)
    ] + [_full(w.shape) for w in edge_ws]                   # MLP weights resident
      + [_full(w.shape) for w in node_ws])

    out_specs = [
        pl.BlockSpec((te, fe_out), lambda t: (t, 0)),       # edge_out tile
        _full((n_pad, fn_out)),                             # x_out (resident)
    ]
    out_shape = [
        jax.ShapeDtypeStruct((e_pad, fe_out), jnp.float32),
        jax.ShapeDtypeStruct((n_pad, fn_out), jnp.float32),
    ]

    kernel = functools.partial(
        _in_layer_kernel, n_ew, n_nw, float(alpha_node), float(alpha_edge),
        bool(apply_beta), float(beta_node), float(beta_edge))

    e_out, x_out = pl.pallas_call(
        kernel,
        grid=(n_tiles,),
        in_specs=in_specs,
        out_specs=out_specs,
        out_shape=out_shape,
        scratch_shapes=[pltpu.VMEM((n_pad, fe_out), jnp.float32)],
        compiler_params=pltpu.CompilerParams(
            dimension_semantics=("arbitrary",)),   # edge-tile axis is a reduction
    )(x_p, e_p, src_col, dst_col, dst_row, deg_p, *edge_ws, *node_ws)
    return x_out, e_out


# --------------------------------------------------------------------- parameters
def init_mlp(key, dims, Cw):
    ws = []
    for i in range(len(dims) - 1):
        key, sub = jax.random.split(key)
        ws.append(jax.random.normal(sub, (dims[i], dims[i + 1]), jnp.float32)
                  * jnp.sqrt(Cw / dims[i]))
    return ws


def _pad_w(w, rows, cols):
    return jnp.pad(w, ((0, rows - w.shape[0]),
                       (0, cols - w.shape[1]))).astype(jnp.bfloat16)


def _split_pad_mlp(raw, split_sizes, split_row_pads, hid_pad, out_pad):
    """Split first weight along its input rows, pad everything to lane multiples."""
    first_cols = hid_pad if len(raw) > 1 else out_pad
    ws, r0 = [], 0
    for sz, rp in zip(split_sizes, split_row_pads):
        ws.append(_pad_w(raw[0][r0:r0 + sz], rp, first_cols))
        r0 += sz
    for w in raw[1:-1]:
        ws.append(_pad_w(w, hid_pad, hid_pad))
    if len(raw) > 1:
        ws.append(_pad_w(raw[-1], hid_pad, out_pad))
    return ws


def init_in_layer(key, node_in, node_out, edge_in, edge_out, width, L_internal, Cw):
    k_e, k_n = jax.random.split(key)
    edge_dims = [2 * node_in + edge_in] + [width] * L_internal + [edge_out]
    node_dims = [node_in + edge_out] + [width] * L_internal + [node_out]
    edge_raw = init_mlp(k_e, edge_dims, Cw)
    node_raw = init_mlp(k_n, node_dims, Cw)

    fn_in_p = _round_up(node_in, LANE)
    fe_in_p = _round_up(edge_in, LANE)
    w_p = _round_up(width, LANE)
    fe_out_p = _round_up(edge_out, LANE)
    fn_out_p = _round_up(node_out, LANE)

    edge_w = _split_pad_mlp(edge_raw, (node_in, node_in, edge_in),
                            (fn_in_p, fn_in_p, fe_in_p), w_p, fe_out_p)
    node_w = _split_pad_mlp(node_raw, (node_in, edge_out),
                            (fn_in_p, fe_out_p), w_p, fn_out_p)
    return {"edge_w": edge_w, "node_w": node_w,
            "node_in": node_in, "node_out": node_out,
            "edge_in": edge_in, "edge_out": edge_out}


def init_ignn(key, node_dims, edge_dims, L, L_internal, width, Cw):
    params = []
    for layer in range(L + 1):
        key, sub = jax.random.split(key)
        l0, lL = layer == 0, layer == L
        params.append(init_in_layer(
            sub,
            node_in=node_dims["in"] if l0 else node_dims["hidden"],
            node_out=node_dims["out"] if lL else node_dims["hidden"],
            edge_in=edge_dims["in"] if l0 else edge_dims["hidden"],
            edge_out=edge_dims["out"] if lL else edge_dims["hidden"],
            width=width, L_internal=L_internal, Cw=Cw))
    return params


# --------------------------------------------------------------------- IGNN forward
def ignn_forward(params, x, edge_index, edge_attr, deg, *,
                 L, beta_node, beta_edge, alpha_node=0.0, alpha_edge=0.0,
                 tile_edges=512):
    N, fn0 = x.shape
    E, fe0 = edge_attr.shape
    n_pad = _round_up(N, SUB)
    if E <= tile_edges:
        e_pad = _round_up(E, SUB)
        te = e_pad
    else:
        e_pad = _round_up(E, tile_edges)   # tile_edges is a multiple of 128
        te = tile_edges

    # One-time padding of the graph tensors (done once, outside the layer loop).
    x_p = jnp.pad(x.astype(jnp.float32),
                  ((0, n_pad - N), (0, _round_up(fn0, LANE) - fn0)))
    e_p = jnp.pad(edge_attr.astype(jnp.float32),
                  ((0, e_pad - E), (0, _round_up(fe0, LANE) - fe0)))

    src = edge_index[0].astype(jnp.int32)
    dst = edge_index[1].astype(jnp.int32)
    pad_idx = jnp.full((e_pad - E,), n_pad, jnp.int32)   # out of range -> inert edges
    src_full = jnp.concatenate([src, pad_idx])
    dst_full = jnp.concatenate([dst, pad_idx])
    src_col = src_full.reshape(e_pad, 1)
    dst_col = dst_full.reshape(e_pad, 1)
    dst_row = dst_full.reshape(1, e_pad)
    deg_p = jnp.concatenate(
        [deg.astype(jnp.float32).reshape(N, 1),
         jnp.ones((n_pad - N, 1), jnp.float32)], axis=0)

    for layer, lp in enumerate(params):
        a_n = alpha_node if (alpha_node != 0.0
                             and lp["node_in"] == lp["node_out"]) else 0.0
        a_e = alpha_edge if (alpha_edge != 0.0
                             and lp["edge_in"] == lp["edge_out"]) else 0.0
        apply_beta = 0 < layer < L
        x_p, e_p = in_layer_forward(
            x_p, e_p, src_col, dst_col, dst_row, deg_p,
            lp["edge_w"], lp["node_w"], tile_edges=te,
            alpha_node=a_n, alpha_edge=a_e, apply_beta=apply_beta,
            beta_node=beta_node, beta_edge=beta_edge)

    fn_out = params[-1]["node_out"]
    fe_out = params[-1]["edge_out"]
    return x_p[:N, :fn_out], e_p[:E, :fe_out]


# --------------------------------------------------------------------- main
if __name__ == "__main__":
    key = jax.random.PRNGKey(0)
    k_x, k_e, k_src, k_dst, k_params = jax.random.split(key, 5)

    # small synthetic graph
    N, E = 16, 32
    node_dims = {"in": 4, "hidden": 8, "out": 4}
    edge_dims = {"in": 3, "hidden": 8, "out": 3}
    L, L_internal, width, Cw = 2, 2, 32, 2.0
    beta_node, beta_edge = 0.5, 0.5

    x = jax.random.normal(k_x, (N, node_dims["in"]), jnp.float32)
    edge_attr = jax.random.normal(k_e, (E, edge_dims["in"]), jnp.float32)
    src = jax.random.randint(k_src, (E,), 0, N)
    dst = jax.random.randint(k_dst, (E,), 0, N)
    edge_index = jnp.stack([src, dst], axis=0)                    # [2, E]
    deg = jnp.maximum(jnp.zeros((N,), jnp.float32).at[dst].add(1.0), 1.0)

    params = init_ignn(k_params, node_dims, edge_dims, L, L_internal, width, Cw)

    x_out, e_out = ignn_forward(params, x, edge_index, edge_attr, deg,
                                L=L, beta_node=beta_node, beta_edge=beta_edge)
    x_out = jax.block_until_ready(x_out)
    e_out = jax.block_until_ready(e_out)

    assert x_out.shape == (N, node_dims["out"])
    assert e_out.shape == (E, edge_dims["out"])
    assert bool(jnp.isfinite(x_out).all()) and bool(jnp.isfinite(e_out).all())
    print("KERNEL_OK")
</pallas_src>

<mosaic_0001>
module attributes {stable_mosaic.version = 11 : i64} {
  func.func @_in_layer_kernel(%arg0: i32, %arg1: memref<16x128xf32, #tpu.memory_space<vmem>>, %arg2: memref<32x128xf32, #tpu.memory_space<vmem>>, %arg3: memref<32x1xi32, #tpu.memory_space<vmem>>, %arg4: memref<32x1xi32, #tpu.memory_space<vmem>>, %arg5: memref<1x32xi32, #tpu.memory_space<vmem>>, %arg6: memref<16x1xf32, #tpu.memory_space<vmem>>, %arg7: memref<128x128xbf16, #tpu.memory_space<vmem>>, %arg8: memref<128x128xbf16, #tpu.memory_space<vmem>>, %arg9: memref<128x128xbf16, #tpu.memory_space<vmem>>, %arg10: memref<128x128xbf16, #tpu.memory_space<vmem>>, %arg11: memref<128x128xbf16, #tpu.memory_space<vmem>>, %arg12: memref<128x128xbf16, #tpu.memory_space<vmem>>, %arg13: memref<128x128xbf16, #tpu.memory_space<vmem>>, %arg14: memref<128x128xbf16, #tpu.memory_space<vmem>>, %arg15: memref<128x128xbf16, #tpu.memory_space<vmem>>, %arg16: memref<32x128xf32, #tpu.memory_space<vmem>>, %arg17: memref<16x128xf32, #tpu.memory_space<vmem>>, %arg18: memref<16x128xf32, #tpu.memory_space<vmem>>) attributes {dimension_semantics = [#tpu.dimension_semantics<arbitrary>], iteration_bounds = array<i64: 1>, scalar_prefetch = 0 : i64, scratch_operands = 1 : i64, tpu.core_type = #tpu.core_type<tc>, window_params = [{pipeline_mode = #tpu.pipeline_mode<synchronous>, transform_indices = @transform_0, window_bounds = array<i64: 16, 128>}, {transform_indices = @transform_1, window_bounds = array<i64: 32, 128>}, {transform_indices = @transform_2, window_bounds = array<i64: 32, 1>}, {transform_indices = @transform_3, window_bounds = array<i64: 32, 1>}, {transform_indices = @transform_4, window_bounds = array<i64: 1, 32>}, {pipeline_mode = #tpu.pipeline_mode<synchronous>, transform_indices = @transform_5, window_bounds = array<i64: 16, 1>}, {pipeline_mode = #tpu.pipeline_mode<synchronous>, transform_indices = @transform_6, window_bounds = array<i64: 128, 128>}, {pipeline_mode = #tpu.pipeline_mode<synchronous>, transform_indices = @transform_7, window_bounds = array<i64: 128, 128>}, {pipeline_mode = #tpu.pipeline_mode<synchronous>, transform_indices = @transform_8, window_bounds = array<i64: 128, 128>}, {pipeline_mode = #tpu.pipeline_mode<synchronous>, transform_indices = @transform_9, window_bounds = array<i64: 128, 128>}, {pipeline_mode = #tpu.pipeline_mode<synchronous>, transform_indices = @transform_10, window_bounds = array<i64: 128, 128>}, {pipeline_mode = #tpu.pipeline_mode<synchronous>, transform_indices = @transform_11, window_bounds = array<i64: 128, 128>}, {pipeline_mode = #tpu.pipeline_mode<synchronous>, transform_indices = @transform_12, window_bounds = array<i64: 128, 128>}, {pipeline_mode = #tpu.pipeline_mode<synchronous>, transform_indices = @transform_13, window_bounds = array<i64: 128, 128>}, {pipeline_mode = #tpu.pipeline_mode<synchronous>, transform_indices = @transform_14, window_bounds = array<i64: 128, 128>}, {transform_indices = @transform_15, window_bounds = array<i64: 32, 128>}, {pipeline_mode = #tpu.pipeline_mode<synchronous>, transform_indices = @transform_16, window_bounds = array<i64: 16, 128>}]} {
    %c0_i32 = arith.constant 0 : i32
    %0 = arith.cmpi eq, %arg0, %c0_i32 : i32
    %1 = arith.extui %0 : i1 to i32
    %c0_i32_0 = arith.constant 0 : i32
    %2 = arith.cmpi ne, %1, %c0_i32_0 : i32
    scf.if %2 {
      %cst_40 = arith.constant 0.000000e+00 : f32
      %68 = vector.broadcast %cst_40 : f32 to vector<16x128xf32>
      %c0_41 = arith.constant 0 : index
      %c0_42 = arith.constant 0 : index
      %69 = vector.load %arg18[%c0_41, %c0_42] : memref<16x128xf32, #tpu.memory_space<vmem>>, vector<16x128xf32>
      tpu.vector_store %arg18[%c0_41, %c0_42], %68 {strides = array<i32>} : memref<16x128xf32, #tpu.memory_space<vmem>>, vector<16x128xf32>,
    } else {
    }
    %c0 = arith.constant 0 : index
    %c0_1 = arith.constant 0 : index
    %3 = vector.load %arg1[%c0, %c0_1] : memref<16x128xf32, #tpu.memory_space<vmem>>, vector<16x128xf32>
    %4 = arith.truncf %3 : vector<16x128xf32> to vector<16x128xbf16>
    %c0_2 = arith.constant 0 : index
    %c0_3 = arith.constant 0 : index
    %5 = vector.load %arg2[%c0_2, %c0_3] : memref<32x128xf32, #tpu.memory_space<vmem>>, vector<32x128xf32>
    %c0_4 = arith.constant 0 : index
    %c0_5 = arith.constant 0 : index
    %6 = vector.load %arg3[%c0_4, %c0_5] : memref<32x1xi32, #tpu.memory_space<vmem>>, vector<32x1xi32>
    %c0_6 = arith.constant 0 : index
    %c0_7 = arith.constant 0 : index
    %7 = vector.load %arg4[%c0_6, %c0_7] : memref<32x1xi32, #tpu.memory_space<vmem>>, vector<32x1xi32>
    %c0_8 = arith.constant 0 : index
    %c0_9 = arith.constant 0 : index
    %8 = vector.load %arg5[%c0_8, %c0_9] : memref<1x32xi32, #tpu.memory_space<vmem>>, vector<1x32xi32>
    %9 = tpu.iota {dimensions = array<i32: 1>} : vector<32x16xi32>
    %10 = vector.broadcast %6 : vector<32x1xi32> to vector<32x16xi32>
    %11 = arith.cmpi eq, %9, %10 : vector<32x16xi32>
    %12 = arith.extui %11 : vector<32x16xi1> to vector<32x16xi32>
    %13 = arith.sitofp %12 : vector<32x16xi32> to vector<32x16xf32>
    %14 = arith.truncf %13 : vector<32x16xf32> to vector<32x16xbf16>
    %15 = vector.broadcast %7 : vector<32x1xi32> to vector<32x16xi32>
    %16 = arith.cmpi eq, %9, %15 : vector<32x16xi32>
    %17 = arith.extui %16 : vector<32x16xi1> to vector<32x16xi32>
    %18 = arith.sitofp %17 : vector<32x16xi32> to vector<32x16xf32>
    %19 = arith.truncf %18 : vector<32x16xf32> to vector<32x16xbf16>
    %20 = tpu.iota {dimensions = array<i32: 0>} : vector<16x32xi32>
    %21 = vector.broadcast %8 : vector<1x32xi32> to vector<16x32xi32>
    %22 = arith.cmpi eq, %20, %21 : vector<16x32xi32>
    %23 = arith.extui %22 : vector<16x32xi1> to vector<16x32xi32>
    %24 = arith.sitofp %23 : vector<16x32xi32> to vector<16x32xf32>
    %25 = arith.truncf %24 : vector<16x32xf32> to vector<16x32xbf16>
    %cst = arith.constant dense<0.000000e+00> : vector<32x128xf32>
    %26 = tpu.matmul %14, %4, %cst {dimension_numbers = #tpu.dot_dimension_numbers<[1], [0], [0], [1], [0, 0, 1, 1], [], []>} : vector<32x16xbf16>, vector<16x128xbf16>, vector<32x128xf32> -> vector<32x128xf32>
    %cst_10 = arith.constant dense<0.000000e+00> : vector<32x128xf32>
    %27 = tpu.matmul %19, %4, %cst_10 {dimension_numbers = #tpu.dot_dimension_numbers<[1], [0], [0], [1], [0, 0, 1, 1], [], []>} : vector<32x16xbf16>, vector<16x128xbf16>, vector<32x128xf32> -> vector<32x128xf32>
    %28 = arith.truncf %26 : vector<32x128xf32> to vector<32x128xbf16>
    %c0_11 = arith.constant 0 : index
    %c0_12 = arith.constant 0 : index
    %29 = vector.load %arg7[%c0_11, %c0_12] : memref<128x128xbf16, #tpu.memory_space<vmem>>, vector<128x128xbf16>
    %cst_13 = arith.constant dense<0.000000e+00> : vector<32x128xf32>
    %30 = tpu.matmul %28, %29, %cst_13 {dimension_numbers = #tpu.dot_dimension_numbers<[1], [0], [0], [1], [0, 0, 1, 1], [], []>} : vector<32x128xbf16>, vector<128x128xbf16>, vector<32x128xf32> -> vector<32x128xf32>
    %31 = arith.truncf %27 : vector<32x128xf32> to vector<32x128xbf16>
    %c0_14 = arith.constant 0 : index
    %c0_15 = arith.constant 0 : index
    %32 = vector.load %arg8[%c0_14, %c0_15] : memref<128x128xbf16, #tpu.memory_space<vmem>>, vector<128x128xbf16>
    %cst_16 = arith.constant dense<0.000000e+00> : vector<32x128xf32>
    %33 = tpu.matmul %31, %32, %cst_16 {dimension_numbers = #tpu.dot_dimension_numbers<[1], [0], [0], [1], [0, 0, 1, 1], [], []>} : vector<32x128xbf16>, vector<128x128xbf16>, vector<32x128xf32> -> vector<32x128xf32>
    %34 = arith.addf %30, %33 : vector<32x128xf32>
    %35 = arith.truncf %5 : vector<32x128xf32> to vector<32x128xbf16>
    %c0_17 = arith.constant 0 : index
    %c0_18 = arith.constant 0 : index
    %36 = vector.load %arg9[%c0_17, %c0_18] : memref<128x128xbf16, #tpu.memory_space<vmem>>, vector<128x128xbf16>
    %cst_19 = arith.constant dense<0.000000e+00> : vector<32x128xf32>
    %37 = tpu.matmul %35, %36, %cst_19 {dimension_numbers = #tpu.dot_dimension_numbers<[1], [0], [0], [1], [0, 0, 1, 1], [], []>} : vector<32x128xbf16>, vector<128x128xbf16>, vector<32x128xf32> -> vector<32x128xf32>
    %38 = arith.addf %34, %37 : vector<32x128xf32>
    %cst_20 = arith.constant 0.000000e+00 : f32
    %39 = vector.broadcast %cst_20 : f32 to vector<32x128xf32>
    %40 = arith.maximumf %38, %39 : vector<32x128xf32>
    %41 = arith.truncf %40 : vector<32x128xf32> to vector<32x128xbf16>
    %c0_21 = arith.constant 0 : index
    %c0_22 = arith.constant 0 : index
    %42 = vector.load %arg10[%c0_21, %c0_22] : memref<128x128xbf16, #tpu.memory_space<vmem>>, vector<128x128xbf16>
    %cst_23 = arith.constant dense<0.000000e+00> : vector<32x128xf32>
    %43 = tpu.matmul %41, %42, %cst_23 {dimension_numbers = #tpu.dot_dimension_numbers<[1], [0], [0], [1], [0, 0, 1, 1], [], []>} : vector<32x128xbf16>, vector<128x128xbf16>, vector<32x128xf32> -> vector<32x128xf32>
    %cst_24 = arith.constant 0.000000e+00 : f32
    %44 = vector.broadcast %cst_24 : f32 to vector<32x128xf32>
    %45 = arith.maximumf %43, %44 : vector<32x128xf32>
    %46 = arith.truncf %45 : vector<32x128xf32> to vector<32x128xbf16>
    %c0_25 = arith.constant 0 : index
    %c0_26 = arith.constant 0 : index
    %47 = vector.load %arg11[%c0_25, %c0_26] : memref<128x128xbf16, #tpu.memory_space<vmem>>, vector<128x128xbf16>
    %cst_27 = arith.constant dense<0.000000e+00> : vector<32x128xf32>
    %48 = tpu.matmul %46, %47, %cst_27 {dimension_numbers = #tpu.dot_dimension_numbers<[1], [0], [0], [1], [0, 0, 1, 1], [], []>} : vector<32x128xbf16>, vector<128x128xbf16>, vector<32x128xf32> -> vector<32x128xf32>
    %c0_28 = arith.constant 0 : index
    %c0_29 = arith.constant 0 : index
    %49 = vector.load %arg18[%c0_28, %c0_29] : memref<16x128xf32, #tpu.memory_space<vmem>>, vector<16x128xf32>
    %50 = arith.truncf %48 : vector<32x128xf32> to vector<32x128xbf16>
    %cst_30 = arith.constant dense<0.000000e+00> : vector<16x128xf32>
    %51 = tpu.matmul %25, %50, %cst_30 {dimension_numbers = #tpu.dot_dimension_numbers<[1], [0], [0], [1], [0, 0, 1, 1], [], []>} : vector<16x32xbf16>, vector<32x128xbf16>, vector<16x128xf32> -> vector<16x128xf32>
    %52 = arith.addf %49, %51 : vector<16x128xf32>
    %c0_31 = arith.constant 0 : index
    %c0_32 = arith.constant 0 : index
    %53 = vector.load %arg18[%c0_31, %c0_32] : memref<16x128xf32, #tpu.memory_space<vmem>>, vector<16x128xf32>
    tpu.vector_store %arg18[%c0_31, %c0_32], %52 {strides = array<i32>} : memref<16x128xf32, #tpu.memory_space<vmem>>, vector<16x128xf32>,
    %54 = arith.mulf %48, %48 : vector<32x128xf32>
    %cst_33 = arith.constant dense<0.000000e+00> : vector<32xf32>
    %55 = vector.multi_reduction <add>, %54, %cst_33 [1] : vector<32x128xf32> to vector<32xf32>
    %56 = vector.shape_cast %55 : vector<32xf32> to vector<32x1xf32>
    %cst_34 = arith.constant 0.000000e+00 : f32
    %57 = vector.broadcast %cst_34 : f32 to vector<32x1xf32>
    %58 = arith.cmpf ogt, %56, %57 : vector<32x1xf32>
    %59 = math.rsqrt %56 : vector<32x1xf32>
    %cst_35 = arith.constant 0.000000e+00 : f32
    %60 = vector.broadcast %cst_35 : f32 to vector<32x1xf32>
    %61 = arith.select %58, %59, %60 : vector<32x1xi1>, vector<32x1xf32>
    %62 = vector.broadcast %61 : vector<32x1xf32> to vector<32x128xf32>
    %63 = arith.mulf %48, %62 : vector<32x128xf32>
    %c0_36 = arith.constant 0 : index
    %c0_37 = arith.constant 0 : index
    %64 = vector.load %arg16[%c0_36, %c0_37] : memref<32x128xf32, #tpu.memory_space<vmem>>, vector<32x128xf32>
    tpu.vector_store %arg16[%c0_36, %c0_37], %63 {strides = array<i32>} : memref<32x128xf32, #tpu.memory_space<vmem>>, vector<32x128xf32>,
    %c0_i32_38 = arith.constant 0 : i32
    %65 = arith.cmpi eq, %arg0, %c0_i32_38 : i32
    %66 = arith.extui %65 : i1 to i32
    %c0_i32_39 = arith.constant 0 : i32
    %67 = arith.cmpi ne, %66, %c0_i32_39 : i32
    scf.if %67 {
      %c0_40 = arith.constant 0 : index
      %c0_41 = arith.constant 0 : index
      %68 = vector.load %arg18[%c0_40, %c0_41] : memref<16x128xf32, #tpu.memory_space<vmem>>, vector<16x128xf32>
      %c0_42 = arith.constant 0 : index
      %c0_43 = arith.constant 0 : index
      %69 = vector.load %arg6[%c0_42, %c0_43] : memref<16x1xf32, #tpu.memory_space<vmem>>, vector<16x1xf32>
      %70 = vector.broadcast %69 : vector<16x1xf32> to vector<16x128xf32>
      %71 = arith.divf %68, %70 : vector<16x128xf32>
      %c0_44 = arith.constant 0 : index
      %c0_45 = arith.constant 0 : index
      %72 = vector.load %arg12[%c0_44, %c0_45] : memref<128x128xbf16, #tpu.memory_space<vmem>>, vector<128x128xbf16>
      %cst_46 = arith.constant dense<0.000000e+00> : vector<16x128xf32>
      %73 = tpu.matmul %4, %72, %cst_46 {dimension_numbers = #tpu.dot_dimension_numbers<[1], [0], [0], [1], [0, 0, 1, 1], [], []>} : vector<16x128xbf16>, vector<128x128xbf16>, vector<16x128xf32> -> vector<16x128xf32>
      %74 = arith.truncf %71 : vector<16x128xf32> to vector<16x128xbf16>
      %c0_47 = arith.constant 0 : index
      %c0_48 = arith.constant 0 : index
      %75 = vector.load %arg13[%c0_47, %c0_48] : memref<128x128xbf16, #tpu.memory_space<vmem>>, vector<128x128xbf16>
      %cst_49 = arith.constant dense<0.000000e+00> : vector<16x128xf32>
      %76 = tpu.matmul %74, %75, %cst_49 {dimension_numbers = #tpu.dot_dimension_numbers<[1], [0], [0], [1], [0, 0, 1, 1], [], []>} : vector<16x128xbf16>, vector<128x128xbf16>, vector<16x128xf32> -> vector<16x128xf32>
      %77 = arith.addf %73, %76 : vector<16x128xf32>
      %cst_50 = arith.constant 0.000000e+00 : f32
      %78 = vector.broadcast %cst_50 : f32 to vector<16x128xf32>
      %79 = arith.maximumf %77, %78 : vector<16x128xf32>
      %80 = arith.truncf %79 : vector<16x128xf32> to vector<16x128xbf16>
      %c0_51 = arith.constant 0 : index
      %c0_52 = arith.constant 0 : index
      %81 = vector.load %arg14[%c0_51, %c0_52] : memref<128x128xbf16, #tpu.memory_space<vmem>>, vector<128x128xbf16>
      %cst_53 = arith.constant dense<0.000000e+00> : vector<16x128xf32>
      %82 = tpu.matmul %80, %81, %cst_53 {dimension_numbers = #tpu.dot_dimension_numbers<[1], [0], [0], [1], [0, 0, 1, 1], [], []>} : vector<16x128xbf16>, vector<128x128xbf16>, vector<16x128xf32> -> vector<16x128xf32>
      %cst_54 = arith.constant 0.000000e+00 : f32
      %83 = vector.broadcast %cst_54 : f32 to vector<16x128xf32>
      %84 = arith.maximumf %82, %83 : vector<16x128xf32>
      %85 = arith.truncf %84 : vector<16x128xf32> to vector<16x128xbf16>
      %c0_55 = arith.constant 0 : index
      %c0_56 = arith.constant 0 : index
      %86 = vector.load %arg15[%c0_55, %c0_56] : memref<128x128xbf16, #tpu.memory_space<vmem>>, vector<128x128xbf16>
      %cst_57 = arith.constant dense<0.000000e+00> : vector<16x128xf32>
      %87 = tpu.matmul %85, %86, %cst_57 {dimension_numbers = #tpu.dot_dimension_numbers<[1], [0], [0], [1], [0, 0, 1, 1], [], []>} : vector<16x128xbf16>, vector<128x128xbf16>, vector<16x128xf32> -> vector<16x128xf32>
      %88 = arith.mulf %87, %87 : vector<16x128xf32>
      %cst_58 = arith.constant dense<0.000000e+00> : vector<16xf32>
      %89 = vector.multi_reduction <add>, %88, %cst_58 [1] : vector<16x128xf32> to vector<16xf32>
      %90 = vector.shape_cast %89 : vector<16xf32> to vector<16x1xf32>
      %cst_59 = arith.constant 0.000000e+00 : f32
      %91 = vector.broadcast %cst_59 : f32 to vector<16x1xf32>
      %92 = arith.cmpf ogt, %90, %91 : vector<16x1xf32>
      %93 = math.rsqrt %90 : vector<16x1xf32>
      %cst_60 = arith.constant 0.000000e+00 : f32
      %94 = vector.broadcast %cst_60 : f32 to vector<16x1xf32>
      %95 = arith.select %92, %93, %94 : vector<16x1xi1>, vector<16x1xf32>
      %96 = vector.broadcast %95 : vector<16x1xf32> to vector<16x128xf32>
      %97 = arith.mulf %87, %96 : vector<16x128xf32>
      %c0_61 = arith.constant 0 : index
      %c0_62 = arith.constant 0 : index
      %98 = vector.load %arg17[%c0_61, %c0_62] : memref<16x128xf32, #tpu.memory_space<vmem>>, vector<16x128xf32>
      tpu.vector_store %arg17[%c0_61, %c0_62], %97 {strides = array<i32>} : memref<16x128xf32, #tpu.memory_space<vmem>>, vector<16x128xf32>,
    } else {
    }
    return
  }
  func.func @transform_0(%arg0: i32) -> (i32, i32) {
    %c0_i32 = arith.constant 0 : i32
    %c0_i32_0 = arith.constant 0 : i32
    %c0_i32_1 = arith.constant 0 : i32
    return %c0_i32, %c0_i32_0 : i32, i32
  }
  func.func @transform_1(%arg0: i32) -> (i32, i32) {
    %c0_i32 = arith.constant 0 : i32
    %c0_i32_0 = arith.constant 0 : i32
    return %arg0, %c0_i32 : i32, i32
  }
  func.func @transform_2(%arg0: i32) -> (i32, i32) {
    %c0_i32 = arith.constant 0 : i32
    %c0_i32_0 = arith.constant 0 : i32
    return %arg0, %c0_i32 : i32, i32
  }
  func.func @transform_3(%arg0: i32) -> (i32, i32) {
    %c0_i32 = arith.constant 0 : i32
    %c0_i32_0 = arith.constant 0 : i32
    return %arg0, %c0_i32 : i32, i32
  }
  func.func @transform_4(%arg0: i32) -> (i32, i32) {
    %c0_i32 = arith.constant 0 : i32
    %c0_i32_0 = arith.constant 0 : i32
    return %c0_i32, %arg0 : i32, i32
  }
  func.func @transform_5(%arg0: i32) -> (i32, i32) {
    %c0_i32 = arith.constant 0 : i32
    %c0_i32_0 = arith.constant 0 : i32
    %c0_i32_1 = arith.constant 0 : i32
    return %c0_i32, %c0_i32_0 : i32, i32
  }
  func.func @transform_6(%arg0: i32) -> (i32, i32) {
    %c0_i32 = arith.constant 0 : i32
    %c0_i32_0 = arith.constant 0 : i32
    %c0_i32_1 = arith.constant 0 : i32
    return %c0_i32, %c0_i32_0 : i32, i32
  }
  func.func @transform_7(%arg0: i32) -> (i32, i32) {
    %c0_i32 = arith.constant 0 : i32
    %c0_i32_0 = arith.constant 0 : i32
    %c0_i32_1 = arith.constant 0 : i32
    return %c0_i32, %c0_i32_0 : i32, i32
  }
  func.func @transform_8(%arg0: i32) -> (i32, i32) {
    %c0_i32 = arith.constant 0 : i32
    %c0_i32_0 = arith.constant 0 : i32
    %c0_i32_1 = arith.constant 0 : i32
    return %c0_i32, %c0_i32_0 : i32, i32
  }
  func.func @transform_9(%arg0: i32) -> (i32, i32) {
    %c0_i32 = arith.constant 0 : i32
    %c0_i32_0 = arith.constant 0 : i32
    %c0_i32_1 = arith.constant 0 : i32
    return %c0_i32, %c0_i32_0 : i32, i32
  }
  func.func @transform_10(%arg0: i32) -> (i32, i32) {
    %c0_i32 = arith.constant 0 : i32
    %c0_i32_0 = arith.constant 0 : i32
    %c0_i32_1 = arith.constant 0 : i32
    return %c0_i32, %c0_i32_0 : i32, i32
  }
  func.func @transform_11(%arg0: i32) -> (i32, i32) {
    %c0_i32 = arith.constant 0 : i32
    %c0_i32_0 = arith.constant 0 : i32
    %c0_i32_1 = arith.constant 0 : i32
    return %c0_i32, %c0_i32_0 : i32, i32
  }
  func.func @transform_12(%arg0: i32) -> (i32, i32) {
    %c0_i32 = arith.constant 0 : i32
    %c0_i32_0 = arith.constant 0 : i32
    %c0_i32_1 = arith.constant 0 : i32
    return %c0_i32, %c0_i32_0 : i32, i32
  }
  func.func @transform_13(%arg0: i32) -> (i32, i32) {
    %c0_i32 = arith.constant 0 : i32
    %c0_i32_0 = arith.constant 0 : i32
    %c0_i32_1 = arith.constant 0 : i32
    return %c0_i32, %c0_i32_0 : i32, i32
  }
  func.func @transform_14(%arg0: i32) -> (i32, i32) {
    %c0_i32 = arith.constant 0 : i32
    %c0_i32_0 = arith.constant 0 : i32
    %c0_i32_1 = arith.constant 0 : i32
    return %c0_i32, %c0_i32_0 : i32, i32
  }
  func.func @transform_15(%arg0: i32) -> (i32, i32) {
    %c0_i32 = arith.constant 0 : i32
    %c0_i32_0 = arith.constant 0 : i32
    return %arg0, %c0_i32 : i32, i32
  }
  func.func @transform_16(%arg0: i32) -> (i32, i32) {
    %c0_i32 = arith.constant 0 : i32
    %c0_i32_0 = arith.constant 0 : i32
    %c0_i32_1 = arith.constant 0 : i32
    return %c0_i32, %c0_i32_0 : i32, i32
  }
}

</mosaic_0001>

<bundles_post_ra>
// kernel: tpu_custom_call.1
= control target key start
LH: loop header
LB: loop body
LE: loop exit
PB: predicated region body
PF: predicated region fallthrough
CT: control target
= control target key end

     0   :  { %s2599_s0 = inlined_call_operand.vmem [shape: f32[16,128], index: 0, kind: input, shape index: {}]   ;;  %s2600_s1 = inlined_call_operand.hbm [shape: f32[32,128], index: 1, kind: input, shape index: {}]   ;;  %s2601_s2 = inlined_call_operand.vmem [shape: s32[32,1], index: 2, kind: input, shape index: {}]   ;;  %s2602_s3 = inlined_call_operand.vmem [shape: s32[32,1], index: 3, kind: input, shape index: {}]   ;;  %s2603_s4 = inlined_call_operand.vmem [shape: s32[1,32], index: 4, kind: input, shape index: {}]   ;;  %s2604_s5 = inlined_call_operand.vmem [shape: f32[16,1], index: 5, kind: input, shape index: {}]   ;;  %s2605_s6 = inlined_call_operand.vmem [shape: bf16[128,128], index: 6, kind: input, shape index: {}]   ;;  %s2606_s7 = inlined_call_operand.hbm [shape: bf16[128,128], index: 7, kind: input, shape index: {}]   ;;  %s2607_s8 = inlined_call_operand.hbm [shape: bf16[128,128], index: 8, kind: input, shape index: {}]   ;;  %s2608_s9 = inlined_call_operand.hbm [shape: bf16[128,128], index: 9, kind: input, shape index: {}]   ;;  %s2609_s10 = inlined_call_operand.hbm [shape: bf16[128,128], index: 10, kind: input, shape index: {}]   ;;  %s2610_s11 = inlined_call_operand.hbm [shape: bf16[128,128], index: 11, kind: input, shape index: {}]   ;;  %s2611_s12 = inlined_call_operand.hbm [shape: bf16[128,128], index: 12, kind: input, shape index: {}]   ;;  %s2612_s13 = inlined_call_operand.hbm [shape: bf16[128,128], index: 13, kind: input, shape index: {}]   ;;  %s2613_s14 = inlined_call_operand.hbm [shape: bf16[128,128], index: 14, kind: input, shape index: {}]   ;;  %s2614_s15 = inlined_call_operand.hbm [shape: f32[32,128], index: 15, kind: output, shape index: {0}]   ;;  %s2615_s16 = inlined_call_operand.hbm [shape: f32[16,128], index: 16, kind: output, shape index: {1}]  }
   0x1   :  { %2617 = sst [smem:[#allocation28_spill]] %s2599_s0 }
   0x2   :  { %22 = vsyncpa [#allocation4], 0 }
   0x3   :  { %23 = vsyncpa [#allocation7], 0 }
   0x4   :  { %24 = vsyncpa [#allocation10], 0 }
   0x5   :  { %25 = vsyncpa [#allocation13], 0 }
   0x6   :  { %26 = vsyncpa [#allocation16], 0 }
   0x7   :  { %27 = vsyncpa [#allocation5], 0 }
   0x8   :  { %28 = vsyncpa [#allocation20], 0  ;;  %s2276_s21 = smov [#allocation6]  }
   0x9   :  { %s58_s22 = sshll.u32 %s2276_s21, 4  ;;  %s59_s22 = int_to_ptr.vmem [resolvable:$true] %s58_s22 }
   0xa   :  { %s2050_s23 = scalar_lea.vmem %s59_s22, 1024  ;;  %p2055_p1 = scmp.lt.s32.totalorder %s59_s22, %s59_s22 }
   0xb   :  { %p2051_p0 = scmp.ne.s32.totalorder %s59_s22, %s2050_s23  ;;  %p2056_p2 = scmp.lt.s32.totalorder %s2050_s23, %s2050_s23 }
   0xd   :  { %p2057_p3 = por %p2056_p2, %p2055_p1 }
   0xf   :  { %p2058_p4 = pnand %p2057_p3, %p2051_p0 }
  0x11   :  { %2061 = shalt.err (!%p2058_p4)
}
  0x12   :  { %s2277_s24 = smov 64   ;;  %s2278_s25 = smov 4  }
  0x13   :  { %64 = dma.hbm_to_vmem [thread:$0]  %s2606_s7, 1024, %s59_s22, [#allocation7], %s2277_s24, %s2277_s24, %s2278_s25  }
  0x14   :  { %s2279_s28 = smov [#allocation9]   ;;  %s2280_s30 = smov [#allocation12]  }
  0x15   :  { %s82_s29 = sshll.u32 %s2279_s28, 4  ;;  %s106_s0 = sshll.u32 %s2280_s30, 4  ;;  %s83_s29 = int_to_ptr.vmem [resolvable:$true] %s82_s29  ;;  %s107_s0 = int_to_ptr.vmem [resolvable:$true] %s106_s0 }
  0x16   :  { %s2070_s17 = scalar_lea.vmem %s83_s29, 1024  ;;  %p2075_p6 = scmp.lt.s32.totalorder %s83_s29, %s83_s29 }
  0x17   :  { %p2071_p5 = scmp.ne.s32.totalorder %s83_s29, %s2070_s17  ;;  %p2076_p7 = scmp.lt.s32.totalorder %s2070_s17, %s2070_s17 }
  0x19   :  { %p2077_p8 = por %p2076_p7, %p2075_p6 }
  0x1b   :  { %p2078_p9 = pnand %p2077_p8, %p2071_p5 }
  0x1d   :  { %2081 = shalt.err (!%p2078_p9)
}
  0x1e   :  { %88 = dma.hbm_to_vmem [thread:$0]  %s2608_s9, 1024, %s83_s29, [#allocation10], %s2277_s24, %s2277_s24, %s2278_s25  }
  0x1f   :  { %s2090_s7 = scalar_lea.vmem %s107_s0, 1024  ;;  %p2095_p11 = scmp.lt.s32.totalorder %s107_s0, %s107_s0 }
  0x20   :  { %p2091_p10 = scmp.ne.s32.totalorder %s107_s0, %s2090_s7  ;;  %p2096_p12 = scmp.lt.s32.totalorder %s2090_s7, %s2090_s7 }
  0x22   :  { %p2097_p13 = por %p2096_p12, %p2095_p11 }
  0x24   :  { %p2098_p0 = pnand %p2097_p13, %p2091_p10 }
  0x26   :  { %2101 = shalt.err (!%p2098_p0)
}
  0x27   :  { %112 = dma.hbm_to_vmem [thread:$0]  %s2610_s11, 1024, %s107_s0, [#allocation13], %s2277_s24, %s2277_s24, %s2278_s25  }
  0x28   :  { %s2281_s22 = smov [#allocation15]   ;;  %s2282_s26 = smov [#allocation3]  }
  0x29   :  { %s130_s23 = sshll.u32 %s2281_s22, 4  ;;  %s36_s9 = sshll.u32 %s2282_s26, 4  ;;  %s131_s23 = int_to_ptr.vmem [resolvable:$true] %s130_s23  ;;  %s37_s9 = int_to_ptr.vmem [resolvable:$true] %s36_s9 }
  0x2a   :  { %s2110_s27 = scalar_lea.vmem %s131_s23, 1024  ;;  %p2115_p2 = scmp.lt.s32.totalorder %s131_s23, %s131_s23 }
  0x2b   :  { %p2111_p1 = scmp.ne.s32.totalorder %s131_s23, %s2110_s27  ;;  %p2116_p3 = scmp.lt.s32.totalorder %s2110_s27, %s2110_s27 }
  0x2d   :  { %p2117_p4 = por %p2116_p3, %p2115_p2 }
  0x2f   :  { %p2118_p5 = pnand %p2117_p4, %p2111_p1 }
  0x31   :  { %2121 = shalt.err (!%p2118_p5)
}
  0x32   :  { %136 = dma.hbm_to_vmem [thread:$0]  %s2612_s13, 1024, %s131_s23, [#allocation16], %s2277_s24, %s2277_s24, %s2278_s25  }
  0x33   :  { %s2130_s11 = scalar_lea.vmem %s37_s9, 512  ;;  %p2135_p7 = scmp.lt.s32.totalorder %s37_s9, %s37_s9 }
  0x34   :  { %p2131_p6 = scmp.ne.s32.totalorder %s37_s9, %s2130_s11  ;;  %p2136_p8 = scmp.lt.s32.totalorder %s2130_s11, %s2130_s11 }
  0x36   :  { %p2137_p9 = por %p2136_p8, %p2135_p7 }
  0x38   :  { %p2138_p10 = pnand %p2137_p9, %p2131_p6 }
  0x3a   :  { %2141 = shalt.err (!%p2138_p10)
}
  0x3b   :  { %s2283_s30 = smov 128   ;;  %s2284_s0 = smov 8  }
  0x3c   :  { %42 = dma.hbm_to_vmem [thread:$0]  %s2600_s1, 512, %s37_s9, [#allocation4], %s2283_s30, %s2283_s30, %s2284_s0  }
  0x3d   :  { %s2285_s19 = smov [#allocation8]   ;;  %s2286_s13 = smov [#allocation11]  }
  0x3e   :  { %s70_s7 = sshll.u32 %s2285_s19, 4  ;;  %s94_s20 = sshll.u32 %s2286_s13, 4  ;;  %s71_s7 = int_to_ptr.vmem [resolvable:$true] %s70_s7  ;;  %s95_s20 = int_to_ptr.vmem [resolvable:$true] %s94_s20 }
  0x3f   :  { %s2150_s21 = scalar_lea.vmem %s71_s7, 1024  ;;  %p2155_p12 = scmp.lt.s32.totalorder %s71_s7, %s71_s7 }
  0x40   :  { %p2151_p11 = scmp.ne.s32.totalorder %s71_s7, %s2150_s21  ;;  %p2156_p13 = scmp.lt.s32.totalorder %s2150_s21, %s2150_s21 }
  0x42   :  { %p2157_p0 = por %p2156_p13, %p2155_p12 }
  0x44   :  { %p2158_p1 = pnand %p2157_p0, %p2151_p11 }
  0x46   :  { %2161 = shalt.err (!%p2158_p1)
}
  0x47   :  { %76 = dma.hbm_to_vmem [thread:$0]  %s2607_s8, 1024, %s71_s7, [#allocation7], %s2277_s24, %s2277_s24, %s2278_s25  }
  0x48   :  { %s2170_s1 = scalar_lea.vmem %s95_s20, 1024  ;;  %p2175_p3 = scmp.lt.s32.totalorder %s95_s20, %s95_s20 }
  0x49   :  { %p2171_p2 = scmp.ne.s32.totalorder %s95_s20, %s2170_s1  ;;  %p2176_p4 = scmp.lt.s32.totalorder %s2170_s1, %s2170_s1 }
  0x4b   :  { %p2177_p5 = por %p2176_p4, %p2175_p3 }
  0x4d   :  { %p2178_p6 = pnand %p2177_p5, %p2171_p2 }
  0x4f   :  { %2181 = shalt.err (!%p2178_p6)
}
  0x50   :  { %100 = dma.hbm_to_vmem [thread:$0]  %s2609_s10, 1024, %s95_s20, [#allocation10], %s2277_s24, %s2277_s24, %s2278_s25  }
  0x51   :  { %s2287_s27 = smov [#allocation14]   ;;  %s2288_s29 = smov [#allocation17]  }
  0x52   :  { %s118_s28 = sshll.u32 %s2287_s27, 4  ;;  %s142_s8 = sshll.u32 %s2288_s29, 4  ;;  %s119_s28 = int_to_ptr.vmem [resolvable:$true] %s118_s28  ;;  %s143_s8 = int_to_ptr.vmem [resolvable:$true] %s142_s8 }
  0x53   :  { %s2190_s11 = scalar_lea.vmem %s119_s28, 1024  ;;  %p2195_p8 = scmp.lt.s32.totalorder %s119_s28, %s119_s28 }
  0x54   :  { %p2191_p7 = scmp.ne.s32.totalorder %s119_s28, %s2190_s11  ;;  %p2196_p9 = scmp.lt.s32.totalorder %s2190_s11, %s2190_s11 }
  0x56   :  { %p2197_p10 = por %p2196_p9, %p2195_p8 }
  0x58   :  { %p2198_p11 = pnand %p2197_p10, %p2191_p7 }
  0x5a   :  { %2201 = shalt.err (!%p2198_p11)
}
  0x5b   :  { %124 = dma.hbm_to_vmem [thread:$0]  %s2611_s12, 1024, %s119_s28, [#allocation13], %s2277_s24, %s2277_s24, %s2278_s25  }
  0x5c   :  { %s2210_s10 = scalar_lea.vmem %s143_s8, 1024  ;;  %p2215_p13 = scmp.lt.s32.totalorder %s143_s8, %s143_s8 }
  0x5d   :  { %p2211_p12 = scmp.ne.s32.totalorder %s143_s8, %s2210_s10  ;;  %p2216_p0 = scmp.lt.s32.totalorder %s2210_s10, %s2210_s10 }
  0x5f   :  { %p2217_p1 = por %p2216_p0, %p2215_p13 }
  0x61   :  { %p2218_p2 = pnand %p2217_p1, %p2211_p12 }
  0x63   :  { %2221 = shalt.err (!%p2218_p2)
}
  0x64   :  { %148 = dma.hbm_to_vmem [thread:$0]  %s2613_s14, 1024, %s143_s8, [#allocation16], %s2277_s24, %s2277_s24, %s2278_s25  }
  0x65   :  { %2262 = dma.done.wait [#allocation4], 512  }
  0x66   :  { %2263 = vsyncadd [#allocation4], 4294966784 }
  0x67   :  { %2264 = dma.done.wait [#allocation7], 2048  }
  0x68   :  { %2265 = vsyncadd [#allocation7], 4294965248 }
  0x69   :  { %2266 = dma.done.wait [#allocation10], 2048  }
  0x6a   :  { %2267 = vsyncadd [#allocation10], 4294965248 }
  0x6b   :  { %2268 = dma.done.wait [#allocation13], 2048  }
  0x6c   :  { %2269 = vsyncadd [#allocation13], 4294965248 }
  0x6d   :  { %2270 = dma.done.wait [#allocation16], 2048  }
  0x6e   :  { %2271 = vsyncadd [#allocation16], 4294965248  ;;  %v2289_v0 = vmov 0   ;;  %v192_v1 = vld [vmem:[%s2601_s2 + $0x10] sm:$0xff]  ;;  %v190_v2 = vld [vmem:[%s2601_s2] sm:$0xff]  ;;  %s2618_s26 = sld [smem:[#allocation28_spill]]  ;;  %v199_v18 = vlaneseq }
  0x6f   :  { %1953 = vset.pattern.permute.xlu1 %v2289_v0  ;;  %1952 = vset.pattern.permute.xlu0 %v2289_v0  ;;  %v193_v3 = vld [vmem:[%s2601_s2 + $0x18] sm:$0xff]  ;;  %v191_v4 = vld [vmem:[%s2601_s2 + $0x8] sm:$0xff]  ;;  %v194_v8 = vld [vmem:[%s2602_s3] sm:$0xff]  ;;  %vm267_vm4 = vcmask 130048   ;;  %v2290_v24 = vmov 0.0   ;;  %vm2291_vm9 = vmmov 0  }
  0x70   :  { %208 = vperm.xlu1 %1953, %v192_v1   ;;  %202 = vperm.xlu0 %1952, %v190_v2   ;;  %v195_v7 = vld [vmem:[%s2602_s3 + $0x8] sm:$0xff]  ;;  %v197_v10 = vld [vmem:[%s2602_s3 + $0x18] sm:$0xff]  ;;  %v196_v11 = vld [vmem:[%s2602_s3 + $0x10] sm:$0xff]  ;;  %v200_v19 = vand.u32 127, %v199_v18  ;;  %vm969_vm12 = vcmask 261120  }
  0x71   :  { %v1056_v12 = vld [vmem:[%s2604_s5 + $0x8] sm:$0xff]  ;;  %v1055_v13 = vld [vmem:[%s2604_s5] sm:$0xff]  ;;  %v1956_v14 = vld [vmem:[#allocation6 + $0x38] sm:$0xff]  }
  0x72   :  { %1746 = vmatprep.subr.bf16.mxu0 %v1956_v14  ;;  %v1958_v15 = vld [vmem:[#allocation6 + $0x30] sm:$0xff]   ;;  %v1960_v16 = vld [vmem:[#allocation6 + $0x28] sm:$0xff]   ;;  %v1962_v17 = vld [vmem:[#allocation6 + $0x20] sm:$0xff]  }
  0x73   :  { %1747 = vmatpush3.bf16.msra.mxu0 %v1956_v14  ;;  %v1954_v33 = vld [vmem:[%s2605_s6 + $0x38] sm:$0xff]   ;;  %v1955_v42 = vld [vmem:[%s2605_s6 + $0x30] sm:$0xff]   ;;  %v1957_v43 = vld [vmem:[%s2605_s6 + $0x28] sm:$0xff]  }
  0x74   :  { %v183_v5 = vld [vmem:[%s2618_s26] sm:$0xff]  ;;  %v184_v6 = vld [vmem:[%s2618_s26 + $0x8] sm:$0xff]  ;;  %211 = vperm.xlu1 %1953, %v193_v3   ;;  %205 = vperm.xlu0 %1952, %v191_v4   ;;  %v1961_v45 = vld [vmem:[%s2605_s6 + $0x18] sm:$0xff]  }
  0x75   :  { %v2457_v9 = vpack.c.bf16 %v184_v6, %v183_v5  ;;  %1748 = vmatprep.subr.bf16.mxu0 %v1958_v15  ;;  %v1959_v44 = vld [vmem:[%s2605_s6 + $0x20] sm:$0xff]   ;;  %v1963_v46 = vld [vmem:[%s2605_s6 + $0x10] sm:$0xff]   ;;  %v1964_v47 = vld [vmem:[#allocation6 + $0x18] sm:$0xff]  }
  0x76   :  { %v1965_v48 = vld [vmem:[%s2605_s6 + $0x8] sm:$0xff]   ;;  %v1966_v49 = vld [vmem:[#allocation6 + $0x10] sm:$0xff]   ;;  %v1967_v50 = vld [vmem:[%s2605_s6] sm:$0xff]  }
  0x77   :  { %1734 = vmatprep.subr.bf16.mxu1 %v2457_v9  ;;  %1749 = vmatpush3.bf16.msra.mxu0 %v1958_v15  ;;  %v1968_v51 = vld [vmem:[#allocation6 + $0x8] sm:$0xff]   ;;  %v1969_v52 = vld [vmem:[#allocation6] sm:$0xff]   ;;  %v1970_v53 = vld [vmem:[#allocation8 + $0x38] sm:$0xff]  }
  0x78   :  { %1735 = vmatpush3.bf16.msra.mxu1 %v2457_v9  ;;  %231 = vperm.xlu1 %1953, %v195_v7   ;;  %v186_v63 = vld [vmem:[#allocation3] sm:$0xff]  ;;  %v187_v0 = vld [vmem:[#allocation3 + $0x8] sm:$0xff]  ;;  %v1971_v5 = vld [vmem:[#allocation8 + $0x30] sm:$0xff]  }
  0x79   :  { %1740 = vmatprep.subr.bf16.mxu1 %v2457_v9  ;;  %228 = vperm.xlu0 %1952, %v194_v8   ;;  %v608_v3 = vpack.c.bf16 %v187_v0, %v186_v63  ;;  %v1972_v6 = vld [vmem:[#allocation8 + $0x28] sm:$0xff]   ;;  %v1973_v7 = vld [vmem:[#allocation8 + $0x20] sm:$0xff]   ;;  %v1974_v8 = vld [vmem:[#allocation8 + $0x18] sm:$0xff]  }
  0x7a   :  { %1750 = vmatprep.subr.bf16.mxu0 %v1960_v16  ;;  %v189_v14 = vld [vmem:[#allocation3 + $0x18] sm:$0xff] }
  0x7b   :  { %1751 = vmatpush3.bf16.msra.mxu0 %v1960_v16  ;;  %v1978_v16 = vld [vmem:[#allocation9 + $0x38] sm:$0xff]  }
  0x7c   :  { %237 = vperm.xlu1 %1953, %v197_v10   ;;  %1752 = vmatprep.subr.bf16.mxu0 %v1962_v17  ;;  %v1975_v10 = vld [vmem:[#allocation8 + $0x10] sm:$0xff]  }
  0x7d   :  { %234 = vperm.xlu0 %1952, %v196_v11   ;;  %v1976_v11 = vld [vmem:[#allocation8 + $0x8] sm:$0xff]  }
  0x7f   :  { %1753 = vmatpush3.bf16.msra.mxu0 %v1962_v17  ;;  %v1979_v17 = vld [vmem:[#allocation9 + $0x30] sm:$0xff]  }
  0x80   :  { %1064 = vperm.xlu1 %1953, %v1056_v12   ;;  %1754 = vmatprep.subr.bf16.mxu0 %v1964_v47  ;;  %v1977_v12 = vld [vmem:[#allocation8] sm:$0xff]  }
  0x81   :  { %1059 = vperm.xlu0 %1952, %v1055_v13   ;;  %v188_v13 = vld [vmem:[#allocation3 + $0x10] sm:$0xff] }
  0x82   :  { %v609_v15 = vpack.c.bf16 %v189_v14, %v188_v13 }
  0x83   :  { %1755 = vmatpush3.bf16.msra.mxu0 %v1964_v47 }
  0x84   :  { %1756 = vmatprep.subr.bf16.mxu0 %v1966_v49 }
  0x87   :  { %1757 = vmatpush3.bf16.msra.mxu0 %v1966_v49 }
  0x88   :  { %1758 = vmatprep.subr.bf16.mxu0 %v1968_v51 }
  0x8b   :  { %1759 = vmatpush3.bf16.msra.mxu0 %v1968_v51 }
  0x8c   :  { %1760 = vmatprep.subr.bf16.mxu0 %v1969_v52 }
  0x8f   :  { %1761 = vmatpush3.bf16.msra.mxu0 %v1969_v52 }
  0x90   :  { %1786 = vmatprep.subr.bf16.mxu0 %v1970_v53 }
  0xeb   :  { %v209_v20 = vpop.permute.xlu1 %208  ;;  %v203_v21 = vpop.permute.xlu0 %202 }
  0xec   :  { %vm215_vm0 = vcmp.eq.s32.totalorder %v200_v19, %v209_v20  ;;  %vm213_vm1 = vcmp.eq.s32.totalorder %v200_v19, %v203_v21  ;;  %v1981_v20 = vld [vmem:[#allocation9 + $0x20] sm:$0xff]   ;;  %v1982_v21 = vld [vmem:[#allocation9 + $0x18] sm:$0xff]  }
  0xed   :  { %v1553_v25 = vsel %vm215_vm0, 1.0, %v2290_v24  ;;  %v1551_v26 = vsel %vm213_vm1, 1.0, %v2290_v24 }
  0xef   :  { %v212_v22 = vpop.permute.xlu1 %211  ;;  %v206_v23 = vpop.permute.xlu0 %205 }
  0xf0   :  { %vm216_vm2 = vcmp.eq.s32.totalorder %v200_v19, %v212_v22  ;;  %vm214_vm3 = vcmp.eq.s32.totalorder %v200_v19, %v206_v23  ;;  %v1983_v22 = vld [vmem:[#allocation9 + $0x10] sm:$0xff]   ;;  %v1984_v23 = vld [vmem:[#allocation9 + $0x8] sm:$0xff]  }
  0xf1   :  { %v1554_v27 = vsel %vm216_vm2, 1.0, %v2290_v24  ;;  %v1552_v28 = vsel %vm214_vm3, 1.0, %v2290_v24 }
  0xf2   :  { %v226_v29 = vpack.c.bf16 %v1554_v27, %v1553_v25  ;;  %v225_v30 = vpack.c.bf16 %v1552_v28, %v1551_v26  ;;  %v1985_v25 = vld [vmem:[#allocation9] sm:$0xff]   ;;  %v1986_v26 = vld [vmem:[#allocation11 + $0x38] sm:$0xff]   ;;  %v1987_v27 = vld [vmem:[#allocation11 + $0x30] sm:$0xff]  }
  0xf3   :  { %v232_v31 = vpop.permute.xlu1 %231  ;;  %v1988_v28 = vld [vmem:[#allocation11 + $0x28] sm:$0xff]  }
  0xf4   :  { %v229_v32 = vpop.permute.xlu0 %228  ;;  %vm240_vm5 = vcmp.eq.s32.totalorder %v200_v19, %v232_v31  ;;  %1736 = vmatprep.mubr.msk.bf16.mxu1 %vm267_vm4, %v225_v30  ;;  %v1990_v30 = vld [vmem:[#allocation11 + $0x18] sm:$0xff]  }
  0xf5   :  { %vm239_vm6 = vcmp.eq.s32.totalorder %v200_v19, %v229_v32  ;;  %v1556_v34 = vsel %vm240_vm5, 1.0, %v2290_v24  ;;  %1737 = vmatmul.mubr.msk.bf16.vlgmr.msra.gmra.mxu1 %vm267_vm4, %v226_v29  ;;  %v1989_v29 = vld [vmem:[#allocation11 + $0x20] sm:$0xff]  }
  0xf6   :  { %v1555_v35 = vsel %vm239_vm6, 1.0, %v2290_v24  ;;  %1741 = vmatpush3.bf16.msra.mxu1 %v2457_v9 }
  0xf7   :  { %v251_v36 = vpack.c.bf16 %v1556_v34, %v1555_v35  ;;  %v238_v37 = vpop.permute.xlu1 %237  ;;  %1766 = vmatprep.subr.bf16.mxu1 %v1954_v33 }
  0xf8   :  { %v235_v38 = vpop.permute.xlu0 %234  ;;  %vm242_vm7 = vcmp.eq.s32.totalorder %v200_v19, %v238_v37 }
  0xf9   :  { %vm241_vm8 = vcmp.eq.s32.totalorder %v200_v19, %v235_v38  ;;  %1742 = vmatprep.mubr.msk.bf16.mxu1 %vm267_vm4, %v251_v36  ;;  %v1558_v39 = vsel %vm242_vm7, 1.0, %v2290_v24  ;;  %v1980_v19 = vld [vmem:[#allocation9 + $0x28] sm:$0xff]  }
  0xfa   :  { %v1557_v40 = vsel %vm241_vm8, 1.0, %v2290_v24 }
  0xfb   :  { %v252_v41 = vpack.c.bf16 %v1558_v39, %v1557_v40 }
  0xfd   :  { %1743 = vmatmul.mubr.msk.bf16.vlgmr.msra.gmra.mxu1 %vm267_vm4, %v252_v41 }
  0xfe   :  { %1767 = vmatpush3.bf16.msra.mxu1 %v1954_v33 }
  0xff   :  { %1768 = vmatprep.subr.bf16.mxu1 %v1955_v42 }
 0x102   :  { %1769 = vmatpush3.bf16.msra.mxu1 %v1955_v42 }
 0x103   :  { %1770 = vmatprep.subr.bf16.mxu1 %v1957_v43 }
 0x106   :  { %1771 = vmatpush3.bf16.msra.mxu1 %v1957_v43 }
 0x107   :  { %1772 = vmatprep.subr.bf16.mxu1 %v1959_v44 }
 0x10a   :  { %1773 = vmatpush3.bf16.msra.mxu1 %v1959_v44 }
 0x10b   :  { %1774 = vmatprep.subr.bf16.mxu1 %v1961_v45 }
 0x10e   :  { %1775 = vmatpush3.bf16.msra.mxu1 %v1961_v45 }
 0x10f   :  { %1776 = vmatprep.subr.bf16.mxu1 %v1963_v46 }
 0x112   :  { %1777 = vmatpush3.bf16.msra.mxu1 %v1963_v46 }
 0x113   :  { %1778 = vmatprep.subr.bf16.mxu1 %v1965_v48 }
 0x116   :  { %1779 = vmatpush3.bf16.msra.mxu1 %v1965_v48 }
 0x117   :  { %1780 = vmatprep.subr.bf16.mxu1 %v1967_v50 }
 0x11a   :  { %1781 = vmatpush3.bf16.msra.mxu1 %v1967_v50 }
 0x11b   :  { %1806 = vmatprep.subr.bf16.mxu1 %v1978_v16 }
 0x1b5   :  { %v1738_v54 = vpop.f32.mrf.mxu1 }
 0x1b7   :  { %v308_v55 = vpop.f32.mrf.mxu1 }
 0x1b9   :  { %v1739_v56 = vpop.f32.mrf.mxu1 }
 0x1ba   :  { %v379_v59 = vpack.c.bf16 %v1739_v56, %v1738_v54 }
 0x1bb   :  { %v311_v57 = vpop.f32.mrf.mxu1 }
 0x1bc   :  { %v378_v58 = vpack.c.bf16 %v311_v57, %v308_v55  ;;  %v1991_v57 = vld [vmem:[#allocation11 + $0x10] sm:$0xff]  }
 0x1bd   :  { %v1744_v60 = vpop.f32.mrf.mxu1 }
 0x1be   :  { %1782 = vmatprep.mubr.bf16.mxu1 %v378_v58  ;;  %v1992_v58 = vld [vmem:[#allocation11 + $0x8] sm:$0xff]  }
 0x1bf   :  { %v363_v61 = vpop.f32.mrf.mxu1  ;;  %1783 = vmatmul.mubr.bf16.vlgmr.msra.gmra.mxu1 %v379_v59  ;;  %v1993_v59 = vld [vmem:[#allocation11] sm:$0xff]  }
 0x1c0   :  { %1807 = vmatpush3.bf16.msra.mxu1 %v1978_v16 }
 0x1c1   :  { %v1745_v62 = vpop.f32.mrf.mxu1  ;;  %1808 = vmatprep.subr.bf16.mxu1 %v1979_v17 }
 0x1c2   :  { %v397_v4 = vpack.c.bf16 %v1745_v62, %v1744_v60 }
 0x1c3   :  { %v366_v1 = vpop.f32.mrf.mxu1 }
 0x1c4   :  { %v396_v2 = vpack.c.bf16 %v366_v1, %v363_v61  ;;  %1809 = vmatpush3.bf16.msra.mxu1 %v1979_v17 }
 0x1c5   :  { %1810 = vmatprep.subr.bf16.mxu1 %v1980_v19 }
 0x1c6   :  { %1762 = vmatprep.mubr.bf16.mxu0 %v396_v2 }
 0x1c7   :  { %1763 = vmatmul.mubr.bf16.vlgmr.msra.gmra.mxu0 %v397_v4 }
 0x1c8   :  { %1787 = vmatpush3.bf16.msra.mxu0 %v1970_v53  ;;  %1802 = vmatprep.mubr.bf16.mxu0 %v608_v3 }
 0x1c9   :  { %1788 = vmatprep.subr.bf16.mxu0 %v1971_v5  ;;  %1811 = vmatpush3.bf16.msra.mxu1 %v1980_v19 }
 0x1ca   :  { %1812 = vmatprep.subr.bf16.mxu1 %v1981_v20 }
 0x1cc   :  { %1789 = vmatpush3.bf16.msra.mxu0 %v1971_v5 }
 0x1cd   :  { %1790 = vmatprep.subr.bf16.mxu0 %v1972_v6  ;;  %1813 = vmatpush3.bf16.msra.mxu1 %v1981_v20 }
 0x1ce   :  { %1814 = vmatprep.subr.bf16.mxu1 %v1982_v21 }
 0x1d0   :  { %1791 = vmatpush3.bf16.msra.mxu0 %v1972_v6  ;;  %v254_v6 = vshrl.u32 %v199_v18, 7 }
 0x1d1   :  { %1792 = vmatprep.subr.bf16.mxu0 %v1973_v7  ;;  %1815 = vmatpush3.bf16.msra.mxu1 %v1982_v21 }
 0x1d2   :  { %1816 = vmatprep.subr.bf16.mxu1 %v1983_v22 }
 0x1d4   :  { %1793 = vmatpush3.bf16.msra.mxu0 %v1973_v7 }
 0x1d5   :  { %1794 = vmatprep.subr.bf16.mxu0 %v1974_v8  ;;  %1817 = vmatpush3.bf16.msra.mxu1 %v1983_v22 }
 0x1d6   :  { %1818 = vmatprep.subr.bf16.mxu1 %v1984_v23 }
 0x1d8   :  { %1795 = vmatpush3.bf16.msra.mxu0 %v1974_v8  ;;  %v255_v8 = vadd.s32 8, %v254_v6 }
 0x1d9   :  { %1796 = vmatprep.subr.bf16.mxu0 %v1975_v10  ;;  %1819 = vmatpush3.bf16.msra.mxu1 %v1984_v23  ;;  %v1994_v23 = vld [vmem:[#allocation12 + $0x38] sm:$0xff]  }
 0x1da   :  { %1820 = vmatprep.subr.bf16.mxu1 %v1985_v25 }
 0x1dc   :  { %1797 = vmatpush3.bf16.msra.mxu0 %v1975_v10 }
 0x1dd   :  { %1798 = vmatprep.subr.bf16.mxu0 %v1976_v11  ;;  %1821 = vmatpush3.bf16.msra.mxu1 %v1985_v25  ;;  %v1996_v25 = vld [vmem:[#allocation14 + $0x38] sm:$0xff]  }
 0x1de   :  { %1846 = vmatprep.subr.bf16.mxu1 %v2290_v24 }
 0x1e0   :  { %1799 = vmatpush3.bf16.msra.mxu0 %v1976_v11  ;;  %v1559_v11 = vld [vmem:[%s2603_s4] ss:$0 sm:$0xff]  ;;  %s2292_s4 = smov [#allocation18]  }
 0x1e1   :  { %1800 = vmatprep.subr.bf16.mxu0 %v1977_v12  ;;  %vm260_vm10 = vcmp.eq.s32.totalorder %v254_v6, %v1559_v11  ;;  %vm261_vm11 = vcmp.eq.s32.totalorder %v255_v8, %v1559_v11  ;;  %v2014_v6 = vld [vmem:[#allocation15 + $0x18] sm:$0xff]   ;;  %v2015_v11 = vld [vmem:[#allocation15 + $0x10] sm:$0xff]   ;;  %s1519_s2 = sshll.u32 %s2292_s4, 4  ;;  %s1520_s2 = int_to_ptr.vmem [resolvable:$true] %s1519_s2 }
 0x1e2   :  { %v1560_v17 = vsel %vm260_vm10, 1.0, %v2290_v24  ;;  %v1561_v19 = vsel %vm261_vm11, 1.0, %v2290_v24  ;;  %s2222_s17 = scalar_lea.vmem %s1520_s2, 512  ;;  %p2227_p4 = scmp.lt.s32.totalorder %s1520_s2, %s1520_s2 }
 0x1e3   :  { %v266_v22 = vpack.c.bf16 %v1561_v19, %v1560_v17  ;;  %v2021_v17 = vld [vmem:[#allocation17 + $0x20] sm:$0xff]   ;;  %v2022_v19 = vld [vmem:[#allocation17 + $0x18] sm:$0xff]   ;;  %p2223_p3 = scmp.ne.s32.totalorder %s1520_s2, %s2222_s17  ;;  %p2228_p5 = scmp.lt.s32.totalorder %s2222_s17, %s2222_s17 }
 0x1e4   :  { %1801 = vmatpush3.bf16.msra.mxu0 %v1977_v12 }
 0x1e5   :  { %1826 = vmatprep.subr.bf16.mxu0 %v1986_v26  ;;  %p2229_p6 = por %p2228_p5, %p2227_p4 }
 0x1e7   :  { %1803 = vmatmul.mubr.bf16.vlgmr.msra.gmra.mxu0 %v609_v15  ;;  %p2230_p7 = pnand %p2229_p6, %p2223_p3 }
 0x1e8   :  { %1827 = vmatpush3.bf16.msra.mxu0 %v1986_v26  ;;  %v1995_v26 = vld [vmem:[#allocation12 + $0x30] sm:$0xff]  }
 0x1e9   :  { %1828 = vmatprep.subr.bf16.mxu0 %v1987_v27 }
 0x1ec   :  { %1829 = vmatpush3.bf16.msra.mxu0 %v1987_v27  ;;  %v1998_v27 = vld [vmem:[#allocation14 + $0x30] sm:$0xff]  }
 0x1ed   :  { %1830 = vmatprep.subr.bf16.mxu0 %v1988_v28 }
 0x1f0   :  { %1831 = vmatpush3.bf16.msra.mxu0 %v1988_v28  ;;  %v1997_v28 = vld [vmem:[#allocation12 + $0x28] sm:$0xff]  }
 0x1f1   :  { %1832 = vmatprep.subr.bf16.mxu0 %v1989_v29 }
 0x1f4   :  { %1833 = vmatpush3.bf16.msra.mxu0 %v1989_v29  ;;  %v2000_v29 = vld [vmem:[#allocation14 + $0x28] sm:$0xff]  }
 0x1f5   :  { %1834 = vmatprep.subr.bf16.mxu0 %v1990_v30 }
 0x1f8   :  { %1835 = vmatpush3.bf16.msra.mxu0 %v1990_v30  ;;  %v1999_v30 = vld [vmem:[#allocation12 + $0x20] sm:$0xff]  }
 0x1f9   :  { %1836 = vmatprep.subr.bf16.mxu0 %v1991_v57 }
 0x1fc   :  { %1837 = vmatpush3.bf16.msra.mxu0 %v1991_v57 }
 0x1fd   :  { %1838 = vmatprep.subr.bf16.mxu0 %v1992_v58 }
 0x200   :  { %1839 = vmatpush3.bf16.msra.mxu0 %v1992_v58 }
 0x201   :  { %1840 = vmatprep.subr.bf16.mxu0 %v1993_v59 }
 0x204   :  { %1841 = vmatpush3.bf16.msra.mxu0 %v1993_v59 }
 0x205   :  { %1874 = vmatprep.subr.bf16.mxu0 %v2290_v24 }
 0x27f   :  { %v1784_v33 = vpop.f32.mrf.mxu1 }
 0x281   :  { %v593_v35 = vpop.f32.mrf.mxu1 }
 0x283   :  { %v1785_v37 = vpop.f32.mrf.mxu1 }
 0x285   :  { %v596_v42 = vpop.f32.mrf.mxu1 }
 0x287   :  { %v1764_v31 = vpop.f32.mrf.mxu0 }
 0x288   :  { %v602_v43 = vadd.f32 %v1784_v33, %v1764_v31  ;;  %v2002_v31 = vld [vmem:[#allocation14 + $0x20] sm:$0xff]   ;;  %v2004_v33 = vld [vmem:[#allocation14 + $0x18] sm:$0xff]  }
 0x289   :  { %v496_v32 = vpop.f32.mrf.mxu0 }
 0x28a   :  { %v594_v40 = vadd.f32 %v593_v35, %v496_v32  ;;  %v2001_v32 = vld [vmem:[#allocation12 + $0x18] sm:$0xff]   ;;  %v2006_v35 = vld [vmem:[#allocation14 + $0x10] sm:$0xff]  }
 0x28b   :  { %v1765_v34 = vpop.f32.mrf.mxu0 }
 0x28c   :  { %v605_v41 = vadd.f32 %v1785_v37, %v1765_v34  ;;  %v2003_v34 = vld [vmem:[#allocation12 + $0x10] sm:$0xff]   ;;  %v2007_v37 = vld [vmem:[#allocation12] sm:$0xff]  }
 0x28d   :  { %v499_v36 = vpop.f32.mrf.mxu0 }
 0x28e   :  { %v597_v45 = vadd.f32 %v596_v42, %v499_v36  ;;  %v2005_v36 = vld [vmem:[#allocation12 + $0x8] sm:$0xff]   ;;  %v1065_v42 = vpop.permute.xlu1 %1064 }
 0x2a7   :  { %v1804_v38 = vpop.f32.mrf.mxu0 }
 0x2a8   :  { %v725_v48 = vadd.f32 %v1804_v38, %v602_v43  ;;  %v2008_v38 = vld [vmem:[#allocation14 + $0x8] sm:$0xff]  }
 0x2a9   :  { %v708_v39 = vpop.f32.mrf.mxu0 }
 0x2aa   :  { %v723_v46 = vadd.f32 %v708_v39, %v594_v40  ;;  %v729_v54 = vmax.f32 %v725_v48, 0.0  ;;  %v2009_v39 = vld [vmem:[#allocation14] sm:$0xff]   ;;  %v1060_v40 = vpop.permute.xlu0 %1059 }
 0x2ab   :  { %v1805_v44 = vpop.f32.mrf.mxu0 }
 0x2ac   :  { %v726_v47 = vadd.f32 %v1805_v44, %v605_v41  ;;  %v727_v52 = vmax.f32 %v723_v46, 0.0 }
 0x2ad   :  { %v711_v49 = vpop.f32.mrf.mxu0 }
 0x2ae   :  { %v724_v50 = vadd.f32 %v711_v49, %v597_v45  ;;  %v730_v51 = vmax.f32 %v726_v47, 0.0 }
 0x2b0   :  { %v728_v53 = vmax.f32 %v724_v50, 0.0  ;;  %v732_v56 = vpack.c.bf16 %v730_v51, %v729_v54 }
 0x2b2   :  { %v731_v55 = vpack.c.bf16 %v728_v53, %v727_v52 }
 0x2b4   :  { %1822 = vmatprep.mubr.bf16.mxu1 %v731_v55 }
 0x2b5   :  { %1823 = vmatmul.mubr.bf16.vlgmr.msra.gmra.mxu1 %v732_v56 }
 0x2b6   :  { %1850 = vmatprep.mubr.msk.bf16.mxu1 %vm2291_vm9, %v2290_v24 }
 0x375   :  { %v1824_v60 = vpop.f32.mrf.mxu1 }
 0x376   :  { %v848_v3 = vmax.f32 %v1824_v60, 0.0 }
 0x377   :  { %v831_v61 = vpop.f32.mrf.mxu1 }
 0x378   :  { %v846_v1 = vmax.f32 %v831_v61, 0.0 }
 0x379   :  { %v1825_v62 = vpop.f32.mrf.mxu1 }
 0x37a   :  { %v849_v63 = vmax.f32 %v1825_v62, 0.0 }
 0x37b   :  { %v834_v0 = vpop.f32.mrf.mxu1 }
 0x37c   :  { %v847_v2 = vmax.f32 %v834_v0, 0.0  ;;  %v851_v5 = vpack.c.bf16 %v849_v63, %v848_v3  ;;  %v2011_v3 = vld [vmem:[#allocation15 + $0x30] sm:$0xff]  }
 0x37e   :  { %v850_v4 = vpack.c.bf16 %v847_v2, %v846_v1  ;;  %v2010_v1 = vld [vmem:[#allocation15 + $0x38] sm:$0xff]  }
 0x380   :  { %1842 = vmatprep.mubr.bf16.mxu0 %v850_v4  ;;  %v2012_v4 = vld [vmem:[#allocation15 + $0x28] sm:$0xff]  }
 0x381   :  { %1843 = vmatmul.mubr.bf16.vlgmr.msra.gmra.mxu0 %v851_v5  ;;  %v2013_v5 = vld [vmem:[#allocation15 + $0x20] sm:$0xff]  }
 0x382   :  { %1890 = vmatprep.mubr.msk.bf16.mxu0 %vm2291_vm9, %v2290_v24  ;;  %1875 = vmatpush3.bf16.msra.mxu0 %v1994_v23 }
 0x383   :  { %1876 = vmatprep.subr.bf16.mxu0 %v2290_v24 }
 0x386   :  { %1877 = vmatpush3.bf16.msra.mxu0 %v1995_v26 }
 0x387   :  { %1878 = vmatprep.subr.bf16.mxu0 %v2290_v24 }
 0x38a   :  { %1879 = vmatpush3.bf16.msra.mxu0 %v1997_v28 }
 0x38b   :  { %1880 = vmatprep.subr.bf16.mxu0 %v2290_v24 }
 0x38e   :  { %1881 = vmatpush3.bf16.msra.mxu0 %v1999_v30 }
 0x38f   :  { %1882 = vmatprep.subr.bf16.mxu0 %v2290_v24 }
 0x392   :  { %1883 = vmatpush3.bf16.msra.mxu0 %v2001_v32  ;;  %v2025_v32 = vld [vmem:[#allocation17] sm:$0xff]  }
 0x393   :  { %1884 = vmatprep.subr.bf16.mxu0 %v2290_v24 }
 0x396   :  { %1885 = vmatpush3.bf16.msra.mxu0 %v2003_v34 }
 0x397   :  { %1886 = vmatprep.subr.bf16.mxu0 %v2290_v24 }
 0x39a   :  { %1887 = vmatpush3.bf16.msra.mxu0 %v2005_v36 }
 0x39b   :  { %1888 = vmatprep.subr.bf16.mxu0 %v2290_v24 }
 0x39e   :  { %1889 = vmatpush3.bf16.msra.mxu0 %v2007_v37 }
 0x39f   :  { %1914 = vmatprep.subr.bf16.mxu0 %v2290_v24 }
 0x3a1   :  { %1891 = vmatmul.mubr.bf16.vlgmr.msra.gmra.mxu0 %v2457_v9 }
 0x3a2   :  { %1930 = vmatprep.mubr.msk.bf16.mxu0 %vm2291_vm9, %v2290_v24 }
 0x441   :  { %v2519_v7 = vpop.f32.mrf.mxu0 }
 0x442   :  { %v1020_v10 = vmul.f32 %v2519_v7, %v2519_v7 }
 0x443   :  { %v2526_v12 = vpop.f32.mrf.mxu0 }
 0x444   :  { %1026 = vadd.xlane.f32.xlu0 %v1020_v10  ;;  %v1018_v14 = vmul.f32 %v2526_v12, %v2526_v12 }
 0x445   :  { %v2528_v13 = vpop.f32.mrf.mxu0 }
 0x446   :  { %v968_v18 = vpack.c.bf16 %v2528_v13, %v2519_v7  ;;  %v1021_v21 = vmul.f32 %v2528_v13, %v2528_v13 }
 0x447   :  { %v2534_v15 = vpop.f32.mrf.mxu0 }
 0x448   :  { %1022 = vadd.xlane.f32.xlu0 %v1018_v14  ;;  %1847 = vmatpush3.bf16.msra.mxu1 %v968_v18  ;;  %v1019_v16 = vmul.f32 %v2534_v15, %v2534_v15  ;;  %v967_v20 = vpack.c.bf16 %v2534_v15, %v2526_v12  ;;  %v2017_v18 = vld [vmem:[#allocation15] sm:$0xff]   ;;  %v2018_v14 = vld [vmem:[#allocation17 + $0x38] sm:$0xff]  }
 0x449   :  { %1848 = vmatprep.subr.bf16.mxu1 %v2290_v24  ;;  %1915 = vmatpush3.bf16.msra.mxu0 %v2018_v14 }
 0x44a   :  { %1024 = vadd.xlane.f32.xlu1 %v1019_v16  ;;  %1916 = vmatprep.subr.bf16.mxu0 %v2290_v24  ;;  %v2020_v16 = vld [vmem:[#allocation17 + $0x28] sm:$0xff]  }
 0x44c   :  { %1028 = vadd.xlane.f32.xlu0 %v1021_v21  ;;  %1849 = vmatpush3.bf16.msra.mxu1 %v967_v20  ;;  %v2023_v20 = vld [vmem:[#allocation17 + $0x10] sm:$0xff]  }
 0x44d   :  { %1854 = vmatprep.subr.bf16.mxu1 %v2290_v24 }
 0x44f   :  { %1851 = vmatmul.mubr.msk.bf16.vlgmr.msra.gmra.mxu1 %vm969_vm12, %v266_v22 }
 0x450   :  { %1870 = vmatprep.mubr.msk.bf16.mxu1 %vm2291_vm9, %v2290_v24  ;;  %1855 = vmatpush3.bf16.msra.mxu1 %v1996_v25 }
 0x451   :  { %1856 = vmatprep.subr.bf16.mxu1 %v2290_v24 }
 0x454   :  { %1857 = vmatpush3.bf16.msra.mxu1 %v1998_v27 }
 0x455   :  { %1858 = vmatprep.subr.bf16.mxu1 %v2290_v24 }
 0x458   :  { %1859 = vmatpush3.bf16.msra.mxu1 %v2000_v29 }
 0x459   :  { %1860 = vmatprep.subr.bf16.mxu1 %v2290_v24 }
 0x45c   :  { %1861 = vmatpush3.bf16.msra.mxu1 %v2002_v31  ;;  %v2024_v31 = vld [vmem:[#allocation17 + $0x8] sm:$0xff]  }
 0x45d   :  { %1862 = vmatprep.subr.bf16.mxu1 %v2290_v24 }
 0x460   :  { %1863 = vmatpush3.bf16.msra.mxu1 %v2004_v33 }
 0x461   :  { %1864 = vmatprep.subr.bf16.mxu1 %v2290_v24 }
 0x464   :  { %1865 = vmatpush3.bf16.msra.mxu1 %v2006_v35 }
 0x465   :  { %1866 = vmatprep.subr.bf16.mxu1 %v2290_v24 }
 0x468   :  { %1867 = vmatpush3.bf16.msra.mxu1 %v2008_v38 }
 0x469   :  { %1868 = vmatprep.subr.bf16.mxu1 %v2290_v24 }
 0x46c   :  { %1869 = vmatpush3.bf16.msra.mxu1 %v2009_v39 }
 0x46d   :  { %1894 = vmatprep.subr.bf16.mxu1 %v2290_v24 }
 0x4cd   :  { %v1027_v41 = vpop.xlane.xlu0 %1026 }
 0x4ce   :  { %2026 = vrsqrt.f32 %v1027_v41  ;;  %vm1032_vm13 = vcmp.gt.f32.partialorder %v1027_v41, 0.0 }
 0x4d1   :  { %v1023_v43 = vpop.xlane.xlu0 %1022 }
 0x4d2   :  { %2028 = vrsqrt.f32 %v1023_v43  ;;  %vm1030_vm14 = vcmp.gt.f32.partialorder %v1023_v43, 0.0 }
 0x4d3   :  { %v1025_v44 = vpop.xlane.xlu1 %1024 }
 0x4d4   :  { %2030 = vrsqrt.f32 %v1025_v44  ;;  %vm1031_vm15 = vcmp.gt.f32.partialorder %v1025_v44, 0.0 }
 0x4d5   :  { %v1029_v45 = vpop.xlane.xlu0 %1028 }
 0x4d6   :  { %2032 = vrsqrt.f32 %v1029_v45  ;;  %vm1033_vm0 = vcmp.gt.f32.partialorder %v1029_v45, 0.0 }
 0x4d7   :  { %2034 = vrcp.f32 %v1065_v42 }
 0x4d8   :  { %2036 = vrcp.f32 %v1060_v40 }
 0x4db   :  { %v2027_v9 = vpop.eup %2026 }
 0x4dc   :  { %v1040_v46 = vsel %vm1032_vm13, %v2027_v9, 0.0 }
 0x4dd   :  { %v1044_v47 = vmul.f32 %v2519_v7, %v1040_v46  ;;  %v1275_v7 = vpop.f32.mrf.mxu0 }
 0x4df   :  { %v2029_v48 = vpop.eup %2028  ;;  %1048 = vst [vmem:[#allocation18 + $0x10] sm:$0xff] %v1044_v47  ;;  %v1892_v8 = vpop.f32.mrf.mxu0 }
 0x4e0   :  { %v1038_v49 = vsel %vm1030_vm14, %v2029_v48, 0.0 }
 0x4e1   :  { %v2031_v50 = vpop.eup %2030  ;;  %v1042_v51 = vmul.f32 %v1038_v49, %v2526_v12  ;;  %v1278_v10 = vpop.f32.mrf.mxu0 }
 0x4e2   :  { %v1039_v52 = vsel %vm1031_vm15, %v2031_v50, 0.0 }
 0x4e3   :  { %v2033_v53 = vpop.eup %2032  ;;  %1046 = vst [vmem:[#allocation18] sm:$0xff] %v1042_v51  ;;  %v1043_v54 = vmul.f32 %v1039_v52, %v2534_v15  ;;  %v1893_v12 = vpop.f32.mrf.mxu0  ;;  %v2019_v15 = vld [vmem:[#allocation17 + $0x30] sm:$0xff]  }
 0x4e4   :  { %v1041_v55 = vsel %vm1033_vm0, %v2033_v53, 0.0  ;;  %v2035_v59 = vpop.eup %2034  ;;  %1917 = vmatpush3.bf16.msra.mxu0 %v2019_v15 }
 0x4e5   :  { %1047 = vst [vmem:[#allocation18 + $0x8] sm:$0xff] %v1043_v54  ;;  %v1045_v56 = vmul.f32 %v2528_v13, %v1041_v55  ;;  %v2037_v60 = vpop.eup %2036  ;;  %v2016_v13 = vld [vmem:[#allocation15 + $0x8] sm:$0xff]   ;;  %1918 = vmatprep.subr.bf16.mxu0 %v2290_v24 }
 0x4e7   :  { %1049 = vst [vmem:[#allocation18 + $0x18] sm:$0xff] %v1045_v56 }
 0x4e8   :  { %1919 = vmatpush3.bf16.msra.mxu0 %v2020_v16 }
 0x4e9   :  { %1920 = vmatprep.subr.bf16.mxu0 %v2290_v24 }
 0x4ec   :  { %1921 = vmatpush3.bf16.msra.mxu0 %v2021_v17 }
 0x4ed   :  { %1922 = vmatprep.subr.bf16.mxu0 %v2290_v24 }
 0x4f0   :  { %1923 = vmatpush3.bf16.msra.mxu0 %v2022_v19 }
 0x4f1   :  { %1924 = vmatprep.subr.bf16.mxu0 %v2290_v24 }
 0x4f4   :  { %1925 = vmatpush3.bf16.msra.mxu0 %v2023_v20 }
 0x4f5   :  { %1926 = vmatprep.subr.bf16.mxu0 %v2290_v24 }
 0x4f8   :  { %1927 = vmatpush3.bf16.msra.mxu0 %v2024_v31 }
 0x4f9   :  { %1928 = vmatprep.subr.bf16.mxu0 %v2290_v24 }
 0x4fc   :  { %1929 = vmatpush3.bf16.msra.mxu0 %v2025_v32 }
 0x50f   :  { %v1007_v57 = vpop.f32.mrf.mxu1 }
 0x510   :  { %v1068_v62 = vmul.f32 %v2037_v60, %v1007_v57 }
 0x511   :  { %v1852_v58 = vpop.f32.mrf.mxu1 }
 0x513   :  { %v1010_v61 = vpop.f32.mrf.mxu1 }
 0x514   :  { %v1070_v63 = vmul.f32 %v2035_v59, %v1010_v61 }
 0x515   :  { %v1853_v0 = vpop.f32.mrf.mxu1 }
 0x516   :  { %v1087_v2 = vpack.c.bf16 %v1070_v63, %v1068_v62 }
 0x518   :  { %1871 = vmatmul.mubr.bf16.vlgmr.msra.gmra.mxu1 %v1087_v2 }
 0x519   :  { %1895 = vmatpush3.bf16.msra.mxu1 %v2010_v1  ;;  %1910 = vmatprep.mubr.msk.bf16.mxu1 %vm2291_vm9, %v2290_v24 }
 0x51a   :  { %1896 = vmatprep.subr.bf16.mxu1 %v2290_v24 }
 0x51d   :  { %1897 = vmatpush3.bf16.msra.mxu1 %v2011_v3 }
 0x51e   :  { %1898 = vmatprep.subr.bf16.mxu1 %v2290_v24 }
 0x521   :  { %1899 = vmatpush3.bf16.msra.mxu1 %v2012_v4 }
 0x522   :  { %1900 = vmatprep.subr.bf16.mxu1 %v2290_v24 }
 0x525   :  { %1901 = vmatpush3.bf16.msra.mxu1 %v2013_v5 }
 0x526   :  { %1902 = vmatprep.subr.bf16.mxu1 %v2290_v24 }
 0x529   :  { %1903 = vmatpush3.bf16.msra.mxu1 %v2014_v6 }
 0x52a   :  { %1904 = vmatprep.subr.bf16.mxu1 %v2290_v24 }
 0x52d   :  { %1905 = vmatpush3.bf16.msra.mxu1 %v2015_v11 }
 0x52e   :  { %1906 = vmatprep.subr.bf16.mxu1 %v2290_v24 }
 0x531   :  { %1907 = vmatpush3.bf16.msra.mxu1 %v2016_v13 }
 0x532   :  { %1908 = vmatprep.subr.bf16.mxu1 %v2290_v24 }
 0x535   :  { %1909 = vmatpush3.bf16.msra.mxu1 %v2017_v18 }
 0x5d8   :  { %v1186_v21 = vpop.f32.mrf.mxu1 }
 0x5d9   :  { %v1276_v23 = vadd.f32 %v1275_v7, %v1186_v21 }
 0x5da   :  { %v1872_v22 = vpop.f32.mrf.mxu1 }
 0x5db   :  { %v1282_v28 = vmax.f32 %v1276_v23, 0.0 }
 0x5dc   :  { %v1189_v25 = vpop.f32.mrf.mxu1 }
 0x5dd   :  { %v1279_v26 = vadd.f32 %v1278_v10, %v1189_v25 }
 0x5de   :  { %v1873_v27 = vpop.f32.mrf.mxu1 }
 0x5df   :  { %v1283_v29 = vmax.f32 %v1279_v26, 0.0 }
 0x5e1   :  { %v1284_v30 = vpack.c.bf16 %v1283_v29, %v1282_v28 }
 0x5e3   :  { %1911 = vmatmul.mubr.bf16.vlgmr.msra.gmra.mxu1 %v1284_v30 }
 0x6a3   :  { %v1383_v33 = vpop.f32.mrf.mxu1 }
 0x6a4   :  { %v1390_v36 = vmax.f32 %v1383_v33, 0.0 }
 0x6a5   :  { %v1912_v34 = vpop.f32.mrf.mxu1 }
 0x6a7   :  { %v1386_v35 = vpop.f32.mrf.mxu1 }
 0x6a8   :  { %v1391_v37 = vmax.f32 %v1386_v35, 0.0 }
 0x6a9   :  { %v1913_v38 = vpop.f32.mrf.mxu1 }
 0x6aa   :  { %v1392_v39 = vpack.c.bf16 %v1391_v37, %v1390_v36 }
 0x6ac   :  { %1931 = vmatmul.mubr.bf16.vlgmr.msra.gmra.mxu0 %v1392_v39 }
 0x76c   :  { %v1491_v40 = vpop.f32.mrf.mxu0 }
 0x76d   :  { %v1498_v41 = vmul.f32 %v1491_v40, %v1491_v40 }
 0x76e   :  { %v1932_v42 = vpop.f32.mrf.mxu0 }
 0x76f   :  { %1500 = vadd.xlane.f32.xlu1 %v1498_v41 }
 0x770   :  { %v1494_v43 = vpop.f32.mrf.mxu0 }
 0x771   :  { %v1499_v44 = vmul.f32 %v1494_v43, %v1494_v43 }
 0x772   :  { %v1933_v45 = vpop.f32.mrf.mxu0 }
 0x773   :  { %1502 = vadd.xlane.f32.xlu0 %v1499_v44 }
 0x774   :  { %2233 = shalt.err (!%p2230_p7)
}
 0x775   :  { %1525 = dma.vmem_to_hbm [thread:$0]  %s1520_s2, 512, %s2614_s15, [#allocation5], %s2283_s30, %s2283_s30, %s2284_s0  }
 0x776   :  { %s2293_s19 = smov [#allocation19]  }
 0x777   :  { %s1531_s7 = sshll.u32 %s2293_s19, 4  ;;  %s1532_s7 = int_to_ptr.vmem [resolvable:$true] %s1531_s7 }
 0x778   :  { %s2242_s12 = scalar_lea.vmem %s1532_s7, 256  ;;  %p2247_p9 = scmp.lt.s32.totalorder %s1532_s7, %s1532_s7 }
 0x779   :  { %p2243_p8 = scmp.ne.s32.totalorder %s1532_s7, %s2242_s12  ;;  %p2248_p10 = scmp.lt.s32.totalorder %s2242_s12, %s2242_s12 }
 0x77b   :  { %p2249_p11 = por %p2248_p10, %p2247_p9 }
 0x77d   :  { %p2250_p12 = pnand %p2249_p11, %p2243_p8 }
 0x7f8   :  { %v1501_v24 = vpop.xlane.xlu1 %1500 }
 0x7f9   :  { %2038 = vrsqrt.f32 %v1501_v24  ;;  %vm1504_vm1 = vcmp.gt.f32.partialorder %v1501_v24, 0.0 }
 0x7fc   :  { %v1503_v9 = vpop.xlane.xlu0 %1502 }
 0x7fd   :  { %2040 = vrsqrt.f32 %v1503_v9  ;;  %vm1505_vm2 = vcmp.gt.f32.partialorder %v1503_v9, 0.0 }
 0x806   :  { %v2039_v46 = vpop.eup %2038 }
 0x807   :  { %v1508_v47 = vsel %vm1504_vm1, %v2039_v46, 0.0 }
 0x808   :  { %v1510_v48 = vmul.f32 %v1508_v47, %v1491_v40 }
 0x80a   :  { %v2041_v49 = vpop.eup %2040  ;;  %1512 = vst [vmem:[#allocation19] sm:$0xff] %v1510_v48 }
 0x80b   :  { %v1509_v50 = vsel %vm1505_vm2, %v2041_v49, 0.0 }
 0x80c   :  { %v1511_v51 = vmul.f32 %v1509_v50, %v1494_v43 }
 0x80e   :  { %1513 = vst [vmem:[#allocation19 + $0x8] sm:$0xff] %v1511_v51 }
 0x80f   :  { %2253 = shalt.err (!%p2250_p12)
}
 0x810   :  { %1537 = dma.vmem_to_hbm [thread:$0]  %s1532_s7, 256, %s2615_s16, [#allocation20], %s2283_s30, %s2283_s30, %s2284_s0  }
 0x811   :  { %2272 = dma.done.wait [#allocation5], 512  }
 0x812   :  { %2273 = vsyncadd [#allocation5], 4294966784 }
 0x813   :  { %2274 = dma.done.wait [#allocation20], 256  }
 0x814   :  { %2275 = vsyncadd [#allocation20], 4294967040 }
 0x815   :  { %1544 = vsyncpa [#allocation4], 1 }
 0x816   :  { %1545 = vsyncpa [#allocation7], 1 }
 0x817   :  { %1546 = vsyncpa [#allocation10], 1 }
 0x818   :  { %1547 = vsyncpa [#allocation13], 1 }
 0x819   :  { %1548 = vsyncpa [#allocation16], 1 }
 0x81a   :  { %1549 = vsyncpa [#allocation5], 1 }
 0x81b   :  { %1550 = vsyncpa [#allocation20], 1 }

</bundles_post_ra>
